<compile_context>
chip_gen: v7x
topology: tpu7x:2x2x1
jax: 0.10.0
libtpu: 0.0.40
codegen_flags: <defaults>
</compile_context>

<pallas_src>
import functools
import math

import jax
import jax.numpy as jnp
from jax import lax
from jax.experimental import pallas as pl
from jax.experimental.pallas import tpu as pltpu

NEG_INF = -1e30  # large finite negative: avoids -inf/NaN hazards in exp/max


def mha_kernel(x_ref, wq_ref, wk_ref, wv_ref, wp_ref, bp_ref, o_ref,
               q_scr, k_scr, v_scr, attn_scr,
               *, num_heads, head_size, use_bf16_exp):
    """One grid step = (batch b, query tile qi); flash-style online softmax."""
    qi = pl.program_id(1)
    hs = head_size
    H = num_heads
    T, C = k_scr.shape            # full sequence length, embedding dim
    tile = q_scr.shape[0]         # query tile size == KV block size

    # ---- K/V projection for the whole row, once per batch element ---------
    @pl.when(qi == 0)
    def _():
        xb = x_ref[...]                                          # (T, C) bf16
        k_scr[...] = jnp.dot(xb, wk_ref[...],
                             preferred_element_type=jnp.float32
                             ).astype(jnp.bfloat16)
        v_scr[...] = jnp.dot(xb, wv_ref[...],
                             preferred_element_type=jnp.float32
                             ).astype(jnp.bfloat16)

    # ---- Q projection for this query tile (score scale folded into Wq) ----
    q_start = pl.multiple_of(qi * tile, tile)
    xq = x_ref[pl.ds(q_start, tile), :]                          # (tile, C) bf16
    q_scr[...] = jnp.dot(xq, wq_ref[...],
                         preferred_element_type=jnp.float32).astype(jnp.bfloat16)

    row_ids = q_start + lax.broadcasted_iota(jnp.int32, (tile, tile), 0)
    col_local = lax.broadcasted_iota(jnp.int32, (tile, tile), 1)
    contract_last = (((1,), (1,)), ((), ()))   # contract over hs, no batch dims

    # ---- per head: online softmax over the causally relevant KV blocks ----
    for h in range(H):
        lo, hi = h * hs, (h + 1) * hs
        q_h = q_scr[:, lo:hi]                                    # (tile, hs) bf16

        def kv_step(kv, carry):
            m_prev, l_prev, acc_prev = carry
            k_start = pl.multiple_of(kv * tile, tile)
            k_h = k_scr[pl.ds(k_start, tile), lo:hi]             # (tile, hs) bf16
            v_h = v_scr[pl.ds(k_start, tile), lo:hi]             # (tile, hs) bf16

            s = lax.dot_general(q_h, k_h, contract_last,
                                preferred_element_type=jnp.float32)  # (tile, tile)
            causal = row_ids >= (k_start + col_local)
            s = jnp.where(causal, s, NEG_INF)

            m_new = jnp.maximum(m_prev, jnp.max(s, axis=-1, keepdims=True))
            alpha = jnp.exp(m_prev - m_new)
            if use_bf16_exp:
                # v6e/v7x only: bf16 EUP exp ~2x f32 throughput; keep f32 on v5e.
                p = jnp.exp((s - m_new).astype(jnp.bfloat16))
                row_sum = jnp.sum(p, axis=-1, keepdims=True, dtype=jnp.float32)
                p_mx = p
            else:
                p = jnp.exp(s - m_new)
                row_sum = jnp.sum(p, axis=-1, keepdims=True)
                p_mx = p.astype(jnp.bfloat16)
            l_new = alpha * l_prev + row_sum
            acc_new = alpha * acc_prev + jnp.dot(
                p_mx, v_h, preferred_element_type=jnp.float32)   # (tile, hs) f32
            return m_new, l_new, acc_new

        init = (jnp.full((tile, 1), NEG_INF, jnp.float32),
                jnp.zeros((tile, 1), jnp.float32),
                jnp.zeros((tile, hs), jnp.float32))
        # Only KV blocks at/below the diagonal are visited: fully-masked causal
        # blocks are skipped entirely (~2x fewer score/PV FLOPs).
        _, l_f, acc_f = lax.fori_loop(0, qi + 1, kv_step, init)

        # normalized head output -> lane offset h*hs of the (tile, C) scratch
        attn_scr[:, lo:hi] = (acc_f * pl.reciprocal(l_f, approx=True)
                              ).astype(jnp.bfloat16)

    # ---- single (tile, C) @ (C, C) output projection + bias ---------------
    y = jnp.dot(attn_scr[...], wp_ref[...], preferred_element_type=jnp.float32)
    o_ref[...] = y + bp_ref[...]


def multi_head_attention(x, wq, wk, wv, wp_t, bp, *, num_heads, n_embd,
                         q_tile=None, use_bf16_exp=False):
    """x: (B, T, C) f32; wq/wk/wv: (H, C, hs); wp_t: (C, C) pre-transposed; bp: (1, C)."""
    B, T, C = x.shape
    H, _, hs = wq.shape
    assert C == n_embd == H * hs and H == num_heads

    # Query/KV tile: >=256 keeps the matmul M dim at full MXU occupancy on
    # v6e/v7x (128 suffices on v5e); clamp to T for short sequences.
    if q_tile is None:
        q_tile = min(T, 256)
    assert T % q_tile == 0
    nq = T // q_tile

    scale = 1.0 / (float(n_embd) ** 0.5)

    def stack_heads(w):                               # (H, C, hs) -> (C, H*hs)
        return jnp.transpose(w, (1, 0, 2)).reshape(C, H * hs)

    wq_f = (stack_heads(wq) * scale).astype(jnp.bfloat16)   # (C, C), scale folded
    wk_f = stack_heads(wk).astype(jnp.bfloat16)              # (C, C)
    wv_f = stack_heads(wv).astype(jnp.bfloat16)              # (C, C)
    wp_f = wp_t.astype(jnp.bfloat16)                         # (C, C)
    bp_f = bp.astype(jnp.float32).reshape(1, C)              # (1, C)
    x_bf = x.astype(jnp.bfloat16)                            # halve x HBM->VMEM DMA

    # explicit scoped-VMEM budget from the actual block + scratch byte counts
    def nb(shape, dt):
        return math.prod(shape) * jnp.dtype(dt).itemsize
    est = (2 * nb((T, C), jnp.bfloat16)                       # x block (double buf)
           + 2 * nb((q_tile, C), jnp.float32)                 # out block (double buf)
           + 2 * (4 * nb((C, C), jnp.bfloat16)                # Wq/Wk/Wv/Wp
                  + nb((1, C), jnp.float32))                  # bias
           + 2 * nb((q_tile, C), jnp.bfloat16)                # q_scr + attn_scr
           + 2 * nb((T, C), jnp.bfloat16))                    # k_scr + v_scr
    vmem_limit = max(int(est * 1.5) + (4 << 20), 32 << 20)

    kernel = functools.partial(mha_kernel, num_heads=H, head_size=hs,
                               use_bf16_exp=use_bf16_exp)

    return pl.pallas_call(
        kernel,
        out_shape=jax.ShapeDtypeStruct((B, T, C), jnp.float32),
        grid_spec=pltpu.PrefetchScalarGridSpec(
            num_scalar_prefetch=0,
            grid=(B, nq),
            in_specs=[
                pl.BlockSpec((None, T, C), lambda b, q: (b, 0, 0)),  # x (bf16), full row
                pl.BlockSpec((C, C), lambda b, q: (0, 0)),           # Wq (scale folded)
                pl.BlockSpec((C, C), lambda b, q: (0, 0)),           # Wk
                pl.BlockSpec((C, C), lambda b, q: (0, 0)),           # Wv
                pl.BlockSpec((C, C), lambda b, q: (0, 0)),           # Wproj^T
                pl.BlockSpec((1, C), lambda b, q: (0, 0)),           # proj bias
            ],
            out_specs=pl.BlockSpec((None, q_tile, C), lambda b, q: (b, q, 0)),
            scratch_shapes=[
                pltpu.VMEM((q_tile, C), jnp.bfloat16),   # Q tile (all heads)
                pltpu.VMEM((T, C), jnp.bfloat16),        # K, whole row, all heads
                pltpu.VMEM((T, C), jnp.bfloat16),        # V, whole row, all heads
                pltpu.VMEM((q_tile, C), jnp.bfloat16),   # concat head outputs
            ],
        ),
        compiler_params=pltpu.CompilerParams(
            # qi must stay "arbitrary": the K/V scratch is filled at qi == 0 and
            # reused by later query tiles of the same batch element.
            dimension_semantics=("parallel", "arbitrary"),
            vmem_limit_bytes=vmem_limit,
        ),
    )(x_bf, wq_f, wk_f, wv_f, wp_f, bp_f)


def reference_mha(x, wq, wk, wv, wp_t, bp, *, n_embd):
    """Pure-JAX f32 reference mirroring the PyTorch module (dropout = identity)."""
    B, T, C = x.shape
    H = wq.shape[0]
    scale = 1.0 / (float(n_embd) ** 0.5)
    tril = jnp.tril(jnp.ones((T, T), dtype=bool))

    outs = []
    for h in range(H):
        q = x @ wq[h]
        k = x @ wk[h]
        v = x @ wv[h]
        wei = (q @ jnp.swapaxes(k, -2, -1)) * scale
        wei = jnp.where(tril, wei, -jnp.inf)
        wei = jax.nn.softmax(wei, axis=-1)
        outs.append(wei @ v)
    cat = jnp.concatenate(outs, axis=-1)
    return cat @ wp_t + bp


if __name__ == "__main__":
    # small config consistent with the module: n_embd = num_heads * head_size
    B, T = 2, 8
    num_heads, head_size = 4, 8
    n_embd = num_heads * head_size        # 32
    block_size = T                        # causal mask covers the full sequence

    key = jax.random.PRNGKey(0)
    kx, kq, kk, kv, kp, kb = jax.random.split(key, 6)

    x = jax.random.normal(kx, (B, T, n_embd), dtype=jnp.float32)

    # nn.Linear(n_embd, head_size, bias=False) weight is (head_size, n_embd);
    # stored transposed as (n_embd, head_size), stacked over heads.
    wq = 0.02 * jax.random.normal(kq, (num_heads, n_embd, head_size), jnp.float32)
    wk = 0.02 * jax.random.normal(kk, (num_heads, n_embd, head_size), jnp.float32)
    wv = 0.02 * jax.random.normal(kv, (num_heads, n_embd, head_size), jnp.float32)

    # nn.Linear(n_embd, n_embd) weight (out, in) -> stored transposed (in, out)
    wp_t = 0.02 * jax.random.normal(kp, (n_embd, n_embd), jnp.float32)
    bp = 0.02 * jax.random.normal(kb, (1, n_embd), jnp.float32)

    out = multi_head_attention(x, wq, wk, wv, wp_t, bp,
                               num_heads=num_heads, n_embd=n_embd)
    out = jax.block_until_ready(out)

    ref = reference_mha(x, wq, wk, wv, wp_t, bp, n_embd=n_embd)
    assert out.shape == (B, T, n_embd)
    # bf16 MXU operands + approx reciprocal -> relaxed tolerance vs f32 reference
    assert jnp.allclose(out, ref, atol=5e-3, rtol=5e-2), "mismatch vs reference"

    print("KERNEL_OK")
</pallas_src>

<mosaic_0001>
module attributes {stable_mosaic.version = 11 : i64} {
  func.func @mha_kernel(%arg0: i32, %arg1: i32, %arg2: memref<1x8x32xbf16, #tpu.memory_space<vmem>>, %arg3: memref<32x32xbf16, #tpu.memory_space<vmem>>, %arg4: memref<32x32xbf16, #tpu.memory_space<vmem>>, %arg5: memref<32x32xbf16, #tpu.memory_space<vmem>>, %arg6: memref<32x32xbf16, #tpu.memory_space<vmem>>, %arg7: memref<1x32xf32, #tpu.memory_space<vmem>>, %arg8: memref<1x8x32xf32, #tpu.memory_space<vmem>>, %arg9: memref<8x32xbf16, #tpu.memory_space<vmem>>, %arg10: memref<8x32xbf16, #tpu.memory_space<vmem>>, %arg11: memref<8x32xbf16, #tpu.memory_space<vmem>>, %arg12: memref<8x32xbf16, #tpu.memory_space<vmem>>) attributes {dimension_semantics = [#tpu.dimension_semantics<parallel>, #tpu.dimension_semantics<arbitrary>], iteration_bounds = array<i64: 2, 1>, scalar_prefetch = 0 : i64, scratch_operands = 4 : i64, tpu.core_type = #tpu.core_type<tc>, window_params = [{transform_indices = @transform_0, window_bounds = array<i64: 1, 8, 32>}, {pipeline_mode = #tpu.pipeline_mode<synchronous>, transform_indices = @transform_1, window_bounds = array<i64: 32, 32>}, {pipeline_mode = #tpu.pipeline_mode<synchronous>, transform_indices = @transform_2, window_bounds = array<i64: 32, 32>}, {pipeline_mode = #tpu.pipeline_mode<synchronous>, transform_indices = @transform_3, window_bounds = array<i64: 32, 32>}, {pipeline_mode = #tpu.pipeline_mode<synchronous>, transform_indices = @transform_4, window_bounds = array<i64: 32, 32>}, {pipeline_mode = #tpu.pipeline_mode<synchronous>, transform_indices = @transform_5, window_bounds = array<i64: 1, 32>}, {transform_indices = @transform_6, window_bounds = array<i64: 1, 8, 32>}]} {
    %c0_i32 = arith.constant 0 : i32
    %0 = arith.cmpi eq, %arg1, %c0_i32 : i32
    %1 = arith.extui %0 : i1 to i32
    %c0_i32_0 = arith.constant 0 : i32
    %2 = arith.cmpi ne, %1, %c0_i32_0 : i32
    scf.if %2 {
      %c0_52 = arith.constant 0 : index
      %c0_53 = arith.constant 0 : index
      %c0_54 = arith.constant 0 : index
      %77 = vector.load %arg2[%c0_52, %c0_53, %c0_54] : memref<1x8x32xbf16, #tpu.memory_space<vmem>>, vector<1x8x32xbf16>
      %78 = vector.shape_cast %77 : vector<1x8x32xbf16> to vector<8x32xbf16>
      %c0_55 = arith.constant 0 : index
      %c0_56 = arith.constant 0 : index
      %79 = vector.load %arg4[%c0_55, %c0_56] : memref<32x32xbf16, #tpu.memory_space<vmem>>, vector<32x32xbf16>
      %cst_57 = arith.constant dense<0.000000e+00> : vector<8x32xf32>
      %80 = tpu.matmul %78, %79, %cst_57 {dimension_numbers = #tpu.dot_dimension_numbers<[1], [0], [0], [1], [0, 0, 1, 1], [], []>} : vector<8x32xbf16>, vector<32x32xbf16>, vector<8x32xf32> -> vector<8x32xf32>
      %81 = arith.truncf %80 : vector<8x32xf32> to vector<8x32xbf16>
      %c0_58 = arith.constant 0 : index
      %c0_59 = arith.constant 0 : index
      %82 = vector.load %arg10[%c0_58, %c0_59] : memref<8x32xbf16, #tpu.memory_space<vmem>>, vector<8x32xbf16>
      tpu.vector_store %arg10[%c0_58, %c0_59], %81 {strides = array<i32>} : memref<8x32xbf16, #tpu.memory_space<vmem>>, vector<8x32xbf16>,
      %c0_60 = arith.constant 0 : index
      %c0_61 = arith.constant 0 : index
      %83 = vector.load %arg5[%c0_60, %c0_61] : memref<32x32xbf16, #tpu.memory_space<vmem>>, vector<32x32xbf16>
      %cst_62 = arith.constant dense<0.000000e+00> : vector<8x32xf32>
      %84 = tpu.matmul %78, %83, %cst_62 {dimension_numbers = #tpu.dot_dimension_numbers<[1], [0], [0], [1], [0, 0, 1, 1], [], []>} : vector<8x32xbf16>, vector<32x32xbf16>, vector<8x32xf32> -> vector<8x32xf32>
      %85 = arith.truncf %84 : vector<8x32xf32> to vector<8x32xbf16>
      %c0_63 = arith.constant 0 : index
      %c0_64 = arith.constant 0 : index
      %86 = vector.load %arg11[%c0_63, %c0_64] : memref<8x32xbf16, #tpu.memory_space<vmem>>, vector<8x32xbf16>
      tpu.vector_store %arg11[%c0_63, %c0_64], %85 {strides = array<i32>} : memref<8x32xbf16, #tpu.memory_space<vmem>>, vector<8x32xbf16>,
    } else {
    }
    %c8_i32 = arith.constant 8 : i32
    %3 = arith.muli %arg1, %c8_i32 : i32
    %4 = tpu.assume_multiple %3, 8 : i32
    %c0 = arith.constant 0 : index
    %5 = arith.index_cast %4 : i32 to index
    %c0_1 = arith.constant 0 : index
    %6 = vector.load %arg2[%c0, %5, %c0_1] : memref<1x8x32xbf16, #tpu.memory_space<vmem>>, vector<1x8x32xbf16>
    %7 = vector.shape_cast %6 : vector<1x8x32xbf16> to vector<8x32xbf16>
    %c0_2 = arith.constant 0 : index
    %c0_3 = arith.constant 0 : index
    %8 = vector.load %arg3[%c0_2, %c0_3] : memref<32x32xbf16, #tpu.memory_space<vmem>>, vector<32x32xbf16>
    %cst = arith.constant dense<0.000000e+00> : vector<8x32xf32>
    %9 = tpu.matmul %7, %8, %cst {dimension_numbers = #tpu.dot_dimension_numbers<[1], [0], [0], [1], [0, 0, 1, 1], [], []>} : vector<8x32xbf16>, vector<32x32xbf16>, vector<8x32xf32> -> vector<8x32xf32>
    %10 = arith.truncf %9 : vector<8x32xf32> to vector<8x32xbf16>
    %c0_4 = arith.constant 0 : index
    %c0_5 = arith.constant 0 : index
    %11 = vector.load %arg9[%c0_4, %c0_5] : memref<8x32xbf16, #tpu.memory_space<vmem>>, vector<8x32xbf16>
    tpu.vector_store %arg9[%c0_4, %c0_5], %10 {strides = array<i32>} : memref<8x32xbf16, #tpu.memory_space<vmem>>, vector<8x32xbf16>,
    %12 = tpu.iota {dimensions = array<i32: 0>} : vector<8x8xi32>
    %13 = vector.broadcast %4 : i32 to vector<8x8xi32>
    %14 = arith.addi %13, %12 : vector<8x8xi32>
    %15 = tpu.iota {dimensions = array<i32: 1>} : vector<8x8xi32>
    %c0_6 = arith.constant 0 : index
    %c0_7 = arith.constant 0 : index
    %16 = vector.load %arg9[%c0_6, %c0_7] : memref<8x32xbf16, #tpu.memory_space<vmem>>, vector<8x8xbf16>
    %cst_8 = arith.constant -1.000000e+30 : f32
    %17 = vector.broadcast %cst_8 : f32 to vector<8x1xf32>
    %cst_9 = arith.constant 0.000000e+00 : f32
    %18 = vector.broadcast %cst_9 : f32 to vector<8x1xf32>
    %cst_10 = arith.constant 0.000000e+00 : f32
    %19 = vector.broadcast %cst_10 : f32 to vector<8x8xf32>
    %c1_i32 = arith.constant 1 : i32
    %20 = arith.addi %arg1, %c1_i32 : i32
    %c0_i32_11 = arith.constant 0 : i32
    %21 = arith.subi %20, %c0_i32_11 : i32
    %22 = arith.addi %c0_i32_11, %21 : i32
    %c1_i32_12 = arith.constant 1 : i32
    %23:3 = scf.for %arg13 = %c0_i32_11 to %22 step %c1_i32_12 iter_args(%arg14 = %17, %arg15 = %18, %arg16 = %19) -> (vector<8x1xf32>, vector<8x1xf32>, vector<8x8xf32>)  : i32 {
      %c8_i32_52 = arith.constant 8 : i32
      %77 = arith.muli %arg13, %c8_i32_52 : i32
      %78 = tpu.assume_multiple %77, 8 : i32
      %79 = arith.index_cast %78 : i32 to index
      %c0_53 = arith.constant 0 : index
      %80 = vector.load %arg10[%79, %c0_53] : memref<8x32xbf16, #tpu.memory_space<vmem>>, vector<8x8xbf16>
      %81 = arith.index_cast %78 : i32 to index
      %c0_54 = arith.constant 0 : index
      %82 = vector.load %arg11[%81, %c0_54] : memref<8x32xbf16, #tpu.memory_space<vmem>>, vector<8x8xbf16>
      %cst_55 = arith.constant dense<0.000000e+00> : vector<8x8xf32>
      %83 = tpu.matmul %16, %80, %cst_55 {dimension_numbers = #tpu.dot_dimension_numbers<[1], [1], [0], [0], [0, 0, 1, 0], [], []>} : vector<8x8xbf16>, vector<8x8xbf16>, vector<8x8xf32> -> vector<8x8xf32>
      %84 = vector.broadcast %78 : i32 to vector<8x8xi32>
      %85 = arith.addi %84, %15 : vector<8x8xi32>
      %86 = arith.cmpi sge, %14, %85 : vector<8x8xi32>
      %cst_56 = arith.constant -1.000000e+30 : f32
      %87 = vector.broadcast %cst_56 : f32 to vector<8x8xf32>
      %88 = arith.select %86, %83, %87 : vector<8x8xi1>, vector<8x8xf32>
      %cst_57 = arith.constant dense<0xFF800000> : vector<8xf32>
      %89 = vector.multi_reduction <maximumf>, %88, %cst_57 [1] : vector<8x8xf32> to vector<8xf32>
      %90 = vector.shape_cast %89 : vector<8xf32> to vector<8x1xf32>
      %91 = arith.maximumf %arg14, %90 : vector<8x1xf32>
      %92 = arith.subf %arg14, %91 : vector<8x1xf32>
      %93 = math.exp %92 : vector<8x1xf32>
      %94 = vector.broadcast %91 : vector<8x1xf32> to vector<8x8xf32>
      %95 = arith.subf %88, %94 : vector<8x8xf32>
      %96 = math.exp %95 : vector<8x8xf32>
      %cst_58 = arith.constant dense<0.000000e+00> : vector<8xf32>
      %97 = vector.multi_reduction <add>, %96, %cst_58 [1] : vector<8x8xf32> to vector<8xf32>
      %98 = vector.shape_cast %97 : vector<8xf32> to vector<8x1xf32>
      %99 = arith.truncf %96 : vector<8x8xf32> to vector<8x8xbf16>
      %100 = arith.mulf %93, %arg15 : vector<8x1xf32>
      %101 = arith.addf %100, %98 : vector<8x1xf32>
      %102 = vector.broadcast %93 : vector<8x1xf32> to vector<8x8xf32>
      %103 = arith.mulf %102, %arg16 : vector<8x8xf32>
      %cst_59 = arith.constant dense<0.000000e+00> : vector<8x8xf32>
      %104 = tpu.matmul %99, %82, %cst_59 {dimension_numbers = #tpu.dot_dimension_numbers<[1], [0], [0], [1], [0, 0, 1, 1], [], []>} : vector<8x8xbf16>, vector<8x8xbf16>, vector<8x8xf32> -> vector<8x8xf32>
      %105 = arith.addf %103, %104 : vector<8x8xf32>
      scf.yield %91, %101, %105 : vector<8x1xf32>, vector<8x1xf32>, vector<8x8xf32>
    }
    %24 = tpu.reciprocal %23#1 {approx = true} : vector<8x1xf32> -> vector<8x1xf32>
    %25 = vector.broadcast %24 : vector<8x1xf32> to vector<8x8xf32>
    %26 = arith.mulf %23#2, %25 : vector<8x8xf32>
    %27 = arith.truncf %26 : vector<8x8xf32> to vector<8x8xbf16>
    %c0_13 = arith.constant 0 : index
    %c0_14 = arith.constant 0 : index
    %28 = vector.load %arg12[%c0_13, %c0_14] : memref<8x32xbf16, #tpu.memory_space<vmem>>, vector<8x8xbf16>
    tpu.vector_store %arg12[%c0_13, %c0_14], %27 {strides = array<i32>} : memref<8x32xbf16, #tpu.memory_space<vmem>>, vector<8x8xbf16>,
    %c0_15 = arith.constant 0 : index
    %c8 = arith.constant 8 : index
    %29 = vector.load %arg9[%c0_15, %c8] : memref<8x32xbf16, #tpu.memory_space<vmem>>, vector<8x8xbf16>
    %cst_16 = arith.constant -1.000000e+30 : f32
    %30 = vector.broadcast %cst_16 : f32 to vector<8x1xf32>
    %cst_17 = arith.constant 0.000000e+00 : f32
    %31 = vector.broadcast %cst_17 : f32 to vector<8x1xf32>
    %cst_18 = arith.constant 0.000000e+00 : f32
    %32 = vector.broadcast %cst_18 : f32 to vector<8x8xf32>
    %c1_i32_19 = arith.constant 1 : i32
    %33 = arith.addi %arg1, %c1_i32_19 : i32
    %c0_i32_20 = arith.constant 0 : i32
    %34 = arith.subi %33, %c0_i32_20 : i32
    %35 = arith.addi %c0_i32_20, %34 : i32
    %c1_i32_21 = arith.constant 1 : i32
    %36:3 = scf.for %arg13 = %c0_i32_20 to %35 step %c1_i32_21 iter_args(%arg14 = %30, %arg15 = %31, %arg16 = %32) -> (vector<8x1xf32>, vector<8x1xf32>, vector<8x8xf32>)  : i32 {
      %c8_i32_52 = arith.constant 8 : i32
      %77 = arith.muli %arg13, %c8_i32_52 : i32
      %78 = tpu.assume_multiple %77, 8 : i32
      %79 = arith.index_cast %78 : i32 to index
      %c8_53 = arith.constant 8 : index
      %80 = vector.load %arg10[%79, %c8_53] : memref<8x32xbf16, #tpu.memory_space<vmem>>, vector<8x8xbf16>
      %81 = arith.index_cast %78 : i32 to index
      %c8_54 = arith.constant 8 : index
      %82 = vector.load %arg11[%81, %c8_54] : memref<8x32xbf16, #tpu.memory_space<vmem>>, vector<8x8xbf16>
      %cst_55 = arith.constant dense<0.000000e+00> : vector<8x8xf32>
      %83 = tpu.matmul %29, %80, %cst_55 {dimension_numbers = #tpu.dot_dimension_numbers<[1], [1], [0], [0], [0, 0, 1, 0], [], []>} : vector<8x8xbf16>, vector<8x8xbf16>, vector<8x8xf32> -> vector<8x8xf32>
      %84 = vector.broadcast %78 : i32 to vector<8x8xi32>
      %85 = arith.addi %84, %15 : vector<8x8xi32>
      %86 = arith.cmpi sge, %14, %85 : vector<8x8xi32>
      %cst_56 = arith.constant -1.000000e+30 : f32
      %87 = vector.broadcast %cst_56 : f32 to vector<8x8xf32>
      %88 = arith.select %86, %83, %87 : vector<8x8xi1>, vector<8x8xf32>
      %cst_57 = arith.constant dense<0xFF800000> : vector<8xf32>
      %89 = vector.multi_reduction <maximumf>, %88, %cst_57 [1] : vector<8x8xf32> to vector<8xf32>
      %90 = vector.shape_cast %89 : vector<8xf32> to vector<8x1xf32>
      %91 = arith.maximumf %arg14, %90 : vector<8x1xf32>
      %92 = arith.subf %arg14, %91 : vector<8x1xf32>
      %93 = math.exp %92 : vector<8x1xf32>
      %94 = vector.broadcast %91 : vector<8x1xf32> to vector<8x8xf32>
      %95 = arith.subf %88, %94 : vector<8x8xf32>
      %96 = math.exp %95 : vector<8x8xf32>
      %cst_58 = arith.constant dense<0.000000e+00> : vector<8xf32>
      %97 = vector.multi_reduction <add>, %96, %cst_58 [1] : vector<8x8xf32> to vector<8xf32>
      %98 = vector.shape_cast %97 : vector<8xf32> to vector<8x1xf32>
      %99 = arith.truncf %96 : vector<8x8xf32> to vector<8x8xbf16>
      %100 = arith.mulf %93, %arg15 : vector<8x1xf32>
      %101 = arith.addf %100, %98 : vector<8x1xf32>
      %102 = vector.broadcast %93 : vector<8x1xf32> to vector<8x8xf32>
      %103 = arith.mulf %102, %arg16 : vector<8x8xf32>
      %cst_59 = arith.constant dense<0.000000e+00> : vector<8x8xf32>
      %104 = tpu.matmul %99, %82, %cst_59 {dimension_numbers = #tpu.dot_dimension_numbers<[1], [0], [0], [1], [0, 0, 1, 1], [], []>} : vector<8x8xbf16>, vector<8x8xbf16>, vector<8x8xf32> -> vector<8x8xf32>
      %105 = arith.addf %103, %104 : vector<8x8xf32>
      scf.yield %91, %101, %105 : vector<8x1xf32>, vector<8x1xf32>, vector<8x8xf32>
    }
    %37 = tpu.reciprocal %36#1 {approx = true} : vector<8x1xf32> -> vector<8x1xf32>
    %38 = vector.broadcast %37 : vector<8x1xf32> to vector<8x8xf32>
    %39 = arith.mulf %36#2, %38 : vector<8x8xf32>
    %40 = arith.truncf %39 : vector<8x8xf32> to vector<8x8xbf16>
    %c0_22 = arith.constant 0 : index
    %c8_23 = arith.constant 8 : index
    %41 = vector.load %arg12[%c0_22, %c8_23] : memref<8x32xbf16, #tpu.memory_space<vmem>>, vector<8x8xbf16>
    tpu.vector_store %arg12[%c0_22, %c8_23], %40 {strides = array<i32>} : memref<8x32xbf16, #tpu.memory_space<vmem>>, vector<8x8xbf16>,
    %c0_24 = arith.constant 0 : index
    %c16 = arith.constant 16 : index
    %42 = vector.load %arg9[%c0_24, %c16] : memref<8x32xbf16, #tpu.memory_space<vmem>>, vector<8x8xbf16>
    %cst_25 = arith.constant -1.000000e+30 : f32
    %43 = vector.broadcast %cst_25 : f32 to vector<8x1xf32>
    %cst_26 = arith.constant 0.000000e+00 : f32
    %44 = vector.broadcast %cst_26 : f32 to vector<8x1xf32>
    %cst_27 = arith.constant 0.000000e+00 : f32
    %45 = vector.broadcast %cst_27 : f32 to vector<8x8xf32>
    %c1_i32_28 = arith.constant 1 : i32
    %46 = arith.addi %arg1, %c1_i32_28 : i32
    %c0_i32_29 = arith.constant 0 : i32
    %47 = arith.subi %46, %c0_i32_29 : i32
    %48 = arith.addi %c0_i32_29, %47 : i32
    %c1_i32_30 = arith.constant 1 : i32
    %49:3 = scf.for %arg13 = %c0_i32_29 to %48 step %c1_i32_30 iter_args(%arg14 = %43, %arg15 = %44, %arg16 = %45) -> (vector<8x1xf32>, vector<8x1xf32>, vector<8x8xf32>)  : i32 {
      %c8_i32_52 = arith.constant 8 : i32
      %77 = arith.muli %arg13, %c8_i32_52 : i32
      %78 = tpu.assume_multiple %77, 8 : i32
      %79 = arith.index_cast %78 : i32 to index
      %c16_53 = arith.constant 16 : index
      %80 = vector.load %arg10[%79, %c16_53] : memref<8x32xbf16, #tpu.memory_space<vmem>>, vector<8x8xbf16>
      %81 = arith.index_cast %78 : i32 to index
      %c16_54 = arith.constant 16 : index
      %82 = vector.load %arg11[%81, %c16_54] : memref<8x32xbf16, #tpu.memory_space<vmem>>, vector<8x8xbf16>
      %cst_55 = arith.constant dense<0.000000e+00> : vector<8x8xf32>
      %83 = tpu.matmul %42, %80, %cst_55 {dimension_numbers = #tpu.dot_dimension_numbers<[1], [1], [0], [0], [0, 0, 1, 0], [], []>} : vector<8x8xbf16>, vector<8x8xbf16>, vector<8x8xf32> -> vector<8x8xf32>
      %84 = vector.broadcast %78 : i32 to vector<8x8xi32>
      %85 = arith.addi %84, %15 : vector<8x8xi32>
      %86 = arith.cmpi sge, %14, %85 : vector<8x8xi32>
      %cst_56 = arith.constant -1.000000e+30 : f32
      %87 = vector.broadcast %cst_56 : f32 to vector<8x8xf32>
      %88 = arith.select %86, %83, %87 : vector<8x8xi1>, vector<8x8xf32>
      %cst_57 = arith.constant dense<0xFF800000> : vector<8xf32>
      %89 = vector.multi_reduction <maximumf>, %88, %cst_57 [1] : vector<8x8xf32> to vector<8xf32>
      %90 = vector.shape_cast %89 : vector<8xf32> to vector<8x1xf32>
      %91 = arith.maximumf %arg14, %90 : vector<8x1xf32>
      %92 = arith.subf %arg14, %91 : vector<8x1xf32>
      %93 = math.exp %92 : vector<8x1xf32>
      %94 = vector.broadcast %91 : vector<8x1xf32> to vector<8x8xf32>
      %95 = arith.subf %88, %94 : vector<8x8xf32>
      %96 = math.exp %95 : vector<8x8xf32>
      %cst_58 = arith.constant dense<0.000000e+00> : vector<8xf32>
      %97 = vector.multi_reduction <add>, %96, %cst_58 [1] : vector<8x8xf32> to vector<8xf32>
      %98 = vector.shape_cast %97 : vector<8xf32> to vector<8x1xf32>
      %99 = arith.truncf %96 : vector<8x8xf32> to vector<8x8xbf16>
      %100 = arith.mulf %93, %arg15 : vector<8x1xf32>
      %101 = arith.addf %100, %98 : vector<8x1xf32>
      %102 = vector.broadcast %93 : vector<8x1xf32> to vector<8x8xf32>
      %103 = arith.mulf %102, %arg16 : vector<8x8xf32>
      %cst_59 = arith.constant dense<0.000000e+00> : vector<8x8xf32>
      %104 = tpu.matmul %99, %82, %cst_59 {dimension_numbers = #tpu.dot_dimension_numbers<[1], [0], [0], [1], [0, 0, 1, 1], [], []>} : vector<8x8xbf16>, vector<8x8xbf16>, vector<8x8xf32> -> vector<8x8xf32>
      %105 = arith.addf %103, %104 : vector<8x8xf32>
      scf.yield %91, %101, %105 : vector<8x1xf32>, vector<8x1xf32>, vector<8x8xf32>
    }
    %50 = tpu.reciprocal %49#1 {approx = true} : vector<8x1xf32> -> vector<8x1xf32>
    %51 = vector.broadcast %50 : vector<8x1xf32> to vector<8x8xf32>
    %52 = arith.mulf %49#2, %51 : vector<8x8xf32>
    %53 = arith.truncf %52 : vector<8x8xf32> to vector<8x8xbf16>
    %c0_31 = arith.constant 0 : index
    %c16_32 = arith.constant 16 : index
    %54 = vector.load %arg12[%c0_31, %c16_32] : memref<8x32xbf16, #tpu.memory_space<vmem>>, vector<8x8xbf16>
    tpu.vector_store %arg12[%c0_31, %c16_32], %53 {strides = array<i32>} : memref<8x32xbf16, #tpu.memory_space<vmem>>, vector<8x8xbf16>,
    %c0_33 = arith.constant 0 : index
    %c24 = arith.constant 24 : index
    %55 = vector.load %arg9[%c0_33, %c24] : memref<8x32xbf16, #tpu.memory_space<vmem>>, vector<8x8xbf16>
    %cst_34 = arith.constant -1.000000e+30 : f32
    %56 = vector.broadcast %cst_34 : f32 to vector<8x1xf32>
    %cst_35 = arith.constant 0.000000e+00 : f32
    %57 = vector.broadcast %cst_35 : f32 to vector<8x1xf32>
    %cst_36 = arith.constant 0.000000e+00 : f32
    %58 = vector.broadcast %cst_36 : f32 to vector<8x8xf32>
    %c1_i32_37 = arith.constant 1 : i32
    %59 = arith.addi %arg1, %c1_i32_37 : i32
    %c0_i32_38 = arith.constant 0 : i32
    %60 = arith.subi %59, %c0_i32_38 : i32
    %61 = arith.addi %c0_i32_38, %60 : i32
    %c1_i32_39 = arith.constant 1 : i32
    %62:3 = scf.for %arg13 = %c0_i32_38 to %61 step %c1_i32_39 iter_args(%arg14 = %56, %arg15 = %57, %arg16 = %58) -> (vector<8x1xf32>, vector<8x1xf32>, vector<8x8xf32>)  : i32 {
      %c8_i32_52 = arith.constant 8 : i32
      %77 = arith.muli %arg13, %c8_i32_52 : i32
      %78 = tpu.assume_multiple %77, 8 : i32
      %79 = arith.index_cast %78 : i32 to index
      %c24_53 = arith.constant 24 : index
      %80 = vector.load %arg10[%79, %c24_53] : memref<8x32xbf16, #tpu.memory_space<vmem>>, vector<8x8xbf16>
      %81 = arith.index_cast %78 : i32 to index
      %c24_54 = arith.constant 24 : index
      %82 = vector.load %arg11[%81, %c24_54] : memref<8x32xbf16, #tpu.memory_space<vmem>>, vector<8x8xbf16>
      %cst_55 = arith.constant dense<0.000000e+00> : vector<8x8xf32>
      %83 = tpu.matmul %55, %80, %cst_55 {dimension_numbers = #tpu.dot_dimension_numbers<[1], [1], [0], [0], [0, 0, 1, 0], [], []>} : vector<8x8xbf16>, vector<8x8xbf16>, vector<8x8xf32> -> vector<8x8xf32>
      %84 = vector.broadcast %78 : i32 to vector<8x8xi32>
      %85 = arith.addi %84, %15 : vector<8x8xi32>
      %86 = arith.cmpi sge, %14, %85 : vector<8x8xi32>
      %cst_56 = arith.constant -1.000000e+30 : f32
      %87 = vector.broadcast %cst_56 : f32 to vector<8x8xf32>
      %88 = arith.select %86, %83, %87 : vector<8x8xi1>, vector<8x8xf32>
      %cst_57 = arith.constant dense<0xFF800000> : vector<8xf32>
      %89 = vector.multi_reduction <maximumf>, %88, %cst_57 [1] : vector<8x8xf32> to vector<8xf32>
      %90 = vector.shape_cast %89 : vector<8xf32> to vector<8x1xf32>
      %91 = arith.maximumf %arg14, %90 : vector<8x1xf32>
      %92 = arith.subf %arg14, %91 : vector<8x1xf32>
      %93 = math.exp %92 : vector<8x1xf32>
      %94 = vector.broadcast %91 : vector<8x1xf32> to vector<8x8xf32>
      %95 = arith.subf %88, %94 : vector<8x8xf32>
      %96 = math.exp %95 : vector<8x8xf32>
      %cst_58 = arith.constant dense<0.000000e+00> : vector<8xf32>
      %97 = vector.multi_reduction <add>, %96, %cst_58 [1] : vector<8x8xf32> to vector<8xf32>
      %98 = vector.shape_cast %97 : vector<8xf32> to vector<8x1xf32>
      %99 = arith.truncf %96 : vector<8x8xf32> to vector<8x8xbf16>
      %100 = arith.mulf %93, %arg15 : vector<8x1xf32>
      %101 = arith.addf %100, %98 : vector<8x1xf32>
      %102 = vector.broadcast %93 : vector<8x1xf32> to vector<8x8xf32>
      %103 = arith.mulf %102, %arg16 : vector<8x8xf32>
      %cst_59 = arith.constant dense<0.000000e+00> : vector<8x8xf32>
      %104 = tpu.matmul %99, %82, %cst_59 {dimension_numbers = #tpu.dot_dimension_numbers<[1], [0], [0], [1], [0, 0, 1, 1], [], []>} : vector<8x8xbf16>, vector<8x8xbf16>, vector<8x8xf32> -> vector<8x8xf32>
      %105 = arith.addf %103, %104 : vector<8x8xf32>
      scf.yield %91, %101, %105 : vector<8x1xf32>, vector<8x1xf32>, vector<8x8xf32>
    }
    %63 = tpu.reciprocal %62#1 {approx = true} : vector<8x1xf32> -> vector<8x1xf32>
    %64 = vector.broadcast %63 : vector<8x1xf32> to vector<8x8xf32>
    %65 = arith.mulf %62#2, %64 : vector<8x8xf32>
    %66 = arith.truncf %65 : vector<8x8xf32> to vector<8x8xbf16>
    %c0_40 = arith.constant 0 : index
    %c24_41 = arith.constant 24 : index
    %67 = vector.load %arg12[%c0_40, %c24_41] : memref<8x32xbf16, #tpu.memory_space<vmem>>, vector<8x8xbf16>
    tpu.vector_store %arg12[%c0_40, %c24_41], %66 {strides = array<i32>} : memref<8x32xbf16, #tpu.memory_space<vmem>>, vector<8x8xbf16>,
    %c0_42 = arith.constant 0 : index
    %c0_43 = arith.constant 0 : index
    %68 = vector.load %arg12[%c0_42, %c0_43] : memref<8x32xbf16, #tpu.memory_space<vmem>>, vector<8x32xbf16>
    %c0_44 = arith.constant 0 : index
    %c0_45 = arith.constant 0 : index
    %69 = vector.load %arg6[%c0_44, %c0_45] : memref<32x32xbf16, #tpu.memory_space<vmem>>, vector<32x32xbf16>
    %cst_46 = arith.constant dense<0.000000e+00> : vector<8x32xf32>
    %70 = tpu.matmul %68, %69, %cst_46 {dimension_numbers = #tpu.dot_dimension_numbers<[1], [0], [0], [1], [0, 0, 1, 1], [], []>} : vector<8x32xbf16>, vector<32x32xbf16>, vector<8x32xf32> -> vector<8x32xf32>
    %c0_47 = arith.constant 0 : index
    %c0_48 = arith.constant 0 : index
    %71 = vector.load %arg7[%c0_47, %c0_48] : memref<1x32xf32, #tpu.memory_space<vmem>>, vector<1x32xf32>
    %72 = vector.broadcast %71 : vector<1x32xf32> to vector<8x32xf32>
    %73 = arith.addf %70, %72 : vector<8x32xf32>
    %c0_49 = arith.constant 0 : index
    %c0_50 = arith.constant 0 : index
    %c0_51 = arith.constant 0 : index
    %74 = vector.load %arg8[%c0_49, %c0_50, %c0_51] : memref<1x8x32xf32, #tpu.memory_space<vmem>>, vector<1x8x32xf32>
    %75 = vector.shape_cast %74 : vector<1x8x32xf32> to vector<8x32xf32>
    %76 = vector.shape_cast %73 : vector<8x32xf32> to vector<1x8x32xf32>
    tpu.vector_store %arg8[%c0_49, %c0_50, %c0_51], %76 {strides = array<i32>} : memref<1x8x32xf32, #tpu.memory_space<vmem>>, vector<1x8x32xf32>,
    return
  }
  func.func @transform_0(%arg0: i32, %arg1: i32) -> (i32, i32, i32) {
    %c0_i32 = arith.constant 0 : i32
    %c0_i32_0 = arith.constant 0 : i32
    %c0_i32_1 = arith.constant 0 : i32
    return %arg0, %c0_i32, %c0_i32_0 : i32, i32, i32
  }
  func.func @transform_1(%arg0: i32, %arg1: i32) -> (i32, i32) {
    %c0_i32 = arith.constant 0 : i32
    %c0_i32_0 = arith.constant 0 : i32
    %c0_i32_1 = arith.constant 0 : i32
    return %c0_i32, %c0_i32_0 : i32, i32
  }
  func.func @transform_2(%arg0: i32, %arg1: i32) -> (i32, i32) {
    %c0_i32 = arith.constant 0 : i32
    %c0_i32_0 = arith.constant 0 : i32
    %c0_i32_1 = arith.constant 0 : i32
    return %c0_i32, %c0_i32_0 : i32, i32
  }
  func.func @transform_3(%arg0: i32, %arg1: i32) -> (i32, i32) {
    %c0_i32 = arith.constant 0 : i32
    %c0_i32_0 = arith.constant 0 : i32
    %c0_i32_1 = arith.constant 0 : i32
    return %c0_i32, %c0_i32_0 : i32, i32
  }
  func.func @transform_4(%arg0: i32, %arg1: i32) -> (i32, i32) {
    %c0_i32 = arith.constant 0 : i32
    %c0_i32_0 = arith.constant 0 : i32
    %c0_i32_1 = arith.constant 0 : i32
    return %c0_i32, %c0_i32_0 : i32, i32
  }
  func.func @transform_5(%arg0: i32, %arg1: i32) -> (i32, i32) {
    %c0_i32 = arith.constant 0 : i32
    %c0_i32_0 = arith.constant 0 : i32
    %c0_i32_1 = arith.constant 0 : i32
    return %c0_i32, %c0_i32_0 : i32, i32
  }
  func.func @transform_6(%arg0: i32, %arg1: i32) -> (i32, i32, i32) {
    %c0_i32 = arith.constant 0 : i32
    %c0_i32_0 = arith.constant 0 : i32
    return %arg0, %arg1, %c0_i32 : i32, i32, i32
  }
}

</mosaic_0001>

<bundles_post_ra>
// kernel: tpu_custom_call.1
= control target key start
LH: loop header
LB: loop body
LE: loop exit
PB: predicated region body
PF: predicated region fallthrough
CT: control target
= control target key end

     0   :  { %s2816_s0 = inlined_call_operand.hbm [shape: bf16[2,8,32], index: 0, kind: input, shape index: {}]   ;;  %s2817_s1 = inlined_call_operand.hbm [shape: bf16[32,32], index: 1, kind: input, shape index: {}]   ;;  %s2818_s2 = inlined_call_operand.hbm [shape: bf16[32,32], index: 2, kind: input, shape index: {}]   ;;  %s2819_s3 = inlined_call_operand.hbm [shape: bf16[32,32], index: 3, kind: input, shape index: {}]   ;;  %s2820_s4 = inlined_call_operand.hbm [shape: bf16[32,32], index: 4, kind: input, shape index: {}]   ;;  %s2821_s5 = inlined_call_operand.vmem [shape: f32[1,32], index: 5, kind: input, shape index: {}]   ;;  %s2822_s6 = inlined_call_operand.hbm [shape: f32[2,8,32], index: 6, kind: output, shape index: {}]  }
   0x1   :  { %2828 = sst [smem:[#allocation20_spill]] %s2817_s1 }
   0x2   :  { %11 = vsyncpa [#allocation7], 0 }
   0x3   :  { %13 = vsyncpa [#allocation7 + $0x1], 0 }
   0x4   :  { %14 = vsyncpa [#allocation10], 0 }
   0x5   :  { %15 = vsyncpa [#allocation13], 0 }
   0x6   :  { %16 = vsyncpa [#allocation8], 0 }
   0x7   :  { %18 = vsyncpa [#allocation8 + $0x1], 0  ;;  %s2324_s21 = smov 0   ;;  %s2326_s22 = smov 0  }
   0x8   :  { %s2328_s23 = smov 0   ;;  %s2330_s24 = smov 0  }
   0x9   :  { %s2332_s25 = smov 0   ;;  %s2334_s26 = smov 0  }
   0xa LB: > { %s2823_s27 = sadd.s32 4294967295, %s2199_s26   ;;  %p1441_p0 = scmp.ge.s32.totalorder %s2199_s26, 1  ;;  %s2199_s26 = sphi %s2334_s26, %s24_s26   ;;  %s2195_s25 = sphi %s2332_s25, %s2862_s25   ;;  %s2191_s24 = sphi %s2330_s24, %s2861_s24   ;;  %s2187_s23 = sphi %s2328_s23, %s2860_s23   ;;  %s2183_s22 = sphi %s2326_s22, %s2859_s22   ;;  %s2179_s21 = sphi %s2324_s21, %s2858_s21  }
   0xb   : > { %p2358_p1 = scmp.eq.s32.totalorder %s2823_s27, 0  ;;  %p200_p2 = scmp.lt.s32.totalorder %s2199_s26, 3 }
   0xc   : > { %s2265_s30 = smov [#allocation9]   ;;  %s2266_s9 = smov [#allocation12]  }
   0xd   : > { %s2829_s28 = scalar_select %p2358_p1, 1, 0 }
   0xe   : > { %p2363_p3 = pnand %p1441_p0, %p200_p2  ;;  %s212_s7 = sshll.u32 %s2265_s30, 4  ;;  %s2367_s7 = int_to_ptr.vmem [resolvable:$true] %s212_s7 }
   0xf   : > { %s238_s10 = sshll.u32 %s2266_s9, 4  ;;  %s2267_s11 = smov [#allocation11]   ;;  %s2378_s10 = int_to_ptr.vmem [resolvable:$true] %s238_s10 }
  0x10   : > { %s2830_s29 = scalar_select %p2363_p3, 1, 0 }
  0x11   : > { %p1636_p4 = pneg %p2363_p3  ;;  %s2380_s12 = sshll.u32 %s2267_s11, 4  ;;  %s226_s12 = int_to_ptr.vmem [resolvable:$true] %s2380_s12 }
  0x12   : > { %s2832_s1 = sld [smem:[#allocation20_spill]] }
  0x13   : > { %p2374_p6 = pnand %p1636_p4, %p2358_p1 }
  0x15   : > { %p2390_p8 = pneg %p2374_p6 }
  0x18   : > { %s1903_s15 = scalar_lea.hbm %s2832_s1, 256 }
  0x19   : > { %p1904_p7 = scmp.ne.s32.totalorder %s2832_s1, %s1903_s15  ;;  %p1910_p11 = scmp.lt.u32.totalorder %s1903_s15, %s2832_s1 }
  0x1b   : > { %p1906_p9 = pnand %p2390_p8, %p1904_p7 }
  0x1d   : > { %p1907_p10 = pneg %p1906_p9 }
  0x1f   : > { %p1912_p12 = pnand %p1910_p11, %p1907_p10 }
  0x21   : > { %1915 = shalt.err (!%p1912_p12)
}
  0x22   : > { %s1916_s30 = scalar_lea.vmem %s2367_s7, 256  ;;  %p1924_p4 = scmp.lt.s32.totalorder %s2367_s7, %s2367_s7 }
  0x23   : > { %p1917_p13 = scmp.ne.s32.totalorder %s2367_s7, %s1916_s30  ;;  %p1925_p5 = scmp.lt.s32.totalorder %s1916_s30, %s1916_s30 }
  0x25   : > { %p1919_p0 = pnand %p1917_p13, %p2390_p8  ;;  %p1926_p7 = por %p1925_p5, %p1924_p4 }
  0x27   : > { %p1920_p2 = pneg %p1919_p0 }
  0x29   : > { %p1927_p9 = pnand %p1926_p7, %p1920_p2 }
  0x2b   : > { %1930 = shalt.err (!%p1927_p9)
}
  0x2c   : > { %s2268_s9 = smov 64   ;;  %s2269_s11 = smov 4  }
  0x2d   : > { %1639 = dma.hbm_to_vmem [thread:$0]  (!%p2374_p6), %s2832_s1, 256, %s2367_s7, [#allocation10], %s2268_s9, %s2268_s9, %s2269_s11  }
  0x2e   : > { %s1931_s17 = scalar_lea.hbm %s2819_s3, 256 }
  0x2f   : > { %p1932_p5 = scmp.ne.s32.totalorder %s2819_s3, %s1931_s17  ;;  %p1938_p12 = scmp.lt.u32.totalorder %s1931_s17, %s2819_s3 }
  0x31   : > { %p1934_p10 = pnand %p1932_p5, %p2390_p8 }
  0x33   : > { %p1935_p11 = pneg %p1934_p10 }
  0x35   : > { %p1940_p13 = pnand %p1938_p12, %p1935_p11 }
  0x37   : > { %1943 = shalt.err (!%p1940_p13)
}
  0x38   : > { %s1944_s7 = scalar_lea.vmem %s2378_s10, 256  ;;  %p1952_p7 = scmp.lt.s32.totalorder %s2378_s10, %s2378_s10 }
  0x39   : > { %p1945_p0 = scmp.ne.s32.totalorder %s2378_s10, %s1944_s7  ;;  %p1953_p9 = scmp.lt.s32.totalorder %s1944_s7, %s1944_s7 }
  0x3b   : > { %p1947_p2 = pnand %p1945_p0, %p2390_p8  ;;  %p1954_p5 = por %p1953_p9, %p1952_p7 }
  0x3d   : > { %p1948_p4 = pneg %p1947_p2 }
  0x3f   : > { %p1955_p10 = pnand %p1954_p5, %p1948_p4 }
  0x41   : > { %1958 = shalt.err (!%p1955_p10)
}
  0x42   : > { %1645 = dma.hbm_to_vmem [thread:$0]  (!%p2374_p6), %s2819_s3, 256, %s2378_s10, [#allocation13], %s2268_s9, %s2268_s9, %s2269_s11  }
  0x43   : > { %s1959_s16 = scalar_lea.hbm %s2818_s2, 256 }
  0x44   : > { %p1960_p11 = scmp.ne.s32.totalorder %s2818_s2, %s1959_s16  ;;  %p1966_p0 = scmp.lt.u32.totalorder %s1959_s16, %s2818_s2 }
  0x46   : > { %p1962_p12 = pnand %p1960_p11, %p2390_p8 }
  0x48   : > { %p1963_p13 = pneg %p1962_p12 }
  0x4a   : > { %p1968_p2 = pnand %p1966_p0, %p1963_p13 }
  0x4c   : > { %1971 = shalt.err (!%p1968_p2)
}
  0x4d   : > { %s1972_s7 = scalar_lea.vmem %s226_s12, 256  ;;  %p1980_p5 = scmp.lt.s32.totalorder %s226_s12, %s226_s12 }
  0x4e   : > { %p1973_p4 = scmp.ne.s32.totalorder %s226_s12, %s1972_s7  ;;  %p1981_p10 = scmp.lt.s32.totalorder %s1972_s7, %s1972_s7 }
  0x50   : > { %p1975_p7 = pnand %p1973_p4, %p2390_p8  ;;  %p1982_p3 = por %p1981_p10, %p1980_p5 }
  0x52   : > { %p1976_p9 = pneg %p1975_p7 }
  0x54   : > { %p1983_p1 = pnand %p1982_p3, %p1976_p9 }
  0x56   : > { %1986 = shalt.err (!%p1983_p1)
}
  0x57   : > { %1642 = dma.hbm_to_vmem [thread:$0]  (!%p2374_p6), %s2818_s2, 256, %s226_s12, [#allocation10], %s2268_s9, %s2268_s9, %s2269_s11  }
  0x58   : > { %s2270_s13 = smov [#allocation14]   ;;  %s1987_s17 = scalar_lea.hbm %s2820_s4, 256 }
  0x59   : > { %s251_s14 = sshll.u32 %s2270_s13, 4  ;;  %p1988_p1 = scmp.ne.s32.totalorder %s2820_s4, %s1987_s17  ;;  %s252_s14 = int_to_ptr.vmem [resolvable:$true] %s251_s14 }
  0x5a   : > { %p1994_p12 = scmp.lt.u32.totalorder %s1987_s17, %s2820_s4 }
  0x5b   : > { %p1990_p3 = pnand %p1988_p1, %p2390_p8 }
  0x5d   : > { %p1991_p11 = pneg %p1990_p3 }
  0x5f   : > { %p1996_p13 = pnand %p1994_p12, %p1991_p11 }
  0x61   : > { %1999 = shalt.err (!%p1996_p13)
}
  0x62   : > { %s2000_s12 = scalar_lea.vmem %s252_s14, 256  ;;  %p2008_p7 = scmp.lt.s32.totalorder %s252_s14, %s252_s14 }
  0x63   : > { %p2001_p0 = scmp.ne.s32.totalorder %s252_s14, %s2000_s12  ;;  %p2009_p9 = scmp.lt.s32.totalorder %s2000_s12, %s2000_s12 }
  0x65   : > { %p2003_p2 = pnand %p2001_p0, %p2390_p8  ;;  %p2010_p5 = por %p2009_p9, %p2008_p7 }
  0x67   : > { %p2004_p4 = pneg %p2003_p2 }
  0x69   : > { %p2011_p10 = pnand %p2010_p5, %p2004_p4 }
  0x6b   : > { %2014 = shalt.err (!%p2011_p10)
}
  0x6c   : > { %1648 = dma.hbm_to_vmem [thread:$0]  (!%p2374_p6), %s2820_s4, 256, %s252_s14, [#allocation13], %s2268_s9, %s2268_s9, %s2269_s11  }
  0x6d   : > { %s1440_s8 = sadd.s32 4294967294, %s2199_s26   ;;  %s36_s18 = sadd.s32 1, %s2195_s25 }
  0x6e   : > { %p38_p8 = scmp.ge.s32.totalorder %s36_s18, 2  ;;  %s43_s13 = sadd.s32 1, %s2187_s23 }
  0x6f   : > { %p50_p1 = scmp.ne.s32.totalorder %s2187_s23, %s2183_s22  ;;  %p51_p3 = scmp.eq.s32.totalorder %s2199_s26, 0 }
  0x70   : > { %s2864_s18 = smov (%p38_p8, %s36_s18), 0  ;;  %p56_p12 = scmp.ne.s32.totalorder %s2183_s22, %s2179_s21 }
  0x71   : > { %p2491_p11 = por %p51_p3, %p50_p1  ;;  %s40_s9 = ssub.s32 %s2195_s25, %s2864_s18 }
  0x72   : > { %s2835_s11 = sadd.s32 4294967295, %s2199_s26   ;;  %p41_p13 = scmp.eq.s32.totalorder %s40_s9, 0 }
  0x73   : > { %p187_p6 = scmp.eq.s32.totalorder %s2835_s11, 1  ;;  %p2836_p0 = scmp.ne.s32.totalorder %s2829_s28, 0 }
  0x74   : > { %p193_p7 = scmp.eq.s32.totalorder %s1440_s8, 1  ;;  %p1661_p5 = scmp.lt.s32.totalorder %s2199_s26, 2 }
  0x75   : > { %p2503_p2 = por %p2836_p0, %p56_p12  ;;  %p2507_p4 = por %p187_p6, %p50_p1 }
  0x76   : > { %s2512_s17 = scalar_select %p41_p13, %s2187_s23, %s43_s13  }
  0x77   : > { %s2838_s16 = scalar_select %p2507_p4, 1, 0 }
  0x78   : > { %p2514_p9 = por %p193_p7, %p56_p12  ;;  %s268_s20 = sand.u32 1, %s2187_s23  }
  0x79   : > { %s1448_s30 = sshll.u32 %s2195_s25, 6  ;;  %s1447_s7 = sshll.u32 %s268_s20, 2 }
  0x7a   : > { %s2839_s19 = scalar_select %p2514_p9, 1, 0 }
  0x7b   : > { %s2524_s27 = scalar_lea.hbm %s2816_s0, %s1448_s30  ;;  %s272_s8 = scalar_lea.vmem [#allocation6], %s1447_s7 }
  0x7c   : > { %s279_s13 = sshll.u32 %s272_s8, 4  ;;  %p2528_p10 = pnand %p1661_p5, %p2491_p11  ;;  %s2532_s13 = int_to_ptr.vmem [resolvable:$true] %s279_s13 }
  0x7d   : > { %s269_s11 = scalar_lea.sflag [#allocation7], %s268_s20  ;;  %s2015_s1 = scalar_lea.hbm %s2524_s27, 64 }
  0x7e   : > { %p2016_p8 = scmp.ne.s32.totalorder %s2524_s27, %s2015_s1  ;;  %p2017_p1 = pneg %p2528_p10 }
  0x7f   : > { %s2020_s15 = scalar_lea.hbm %s2816_s0, 128  ;;  %p2021_p11 = scmp.lt.u32.totalorder %s2524_s27, %s2816_s0 }
  0x80   : > { %p2018_p3 = pnand %p2017_p1, %p2016_p8  ;;  %p2022_p6 = scmp.lt.u32.totalorder %s2020_s15, %s2015_s1 }
  0x81   : > { %p2024_p0 = scmp.lt.u32.totalorder %s2015_s1, %s2524_s27 }
  0x82   : > { %p2019_p12 = pneg %p2018_p3  ;;  %p2023_p13 = por %p2022_p6, %p2021_p11 }
  0x84   : > { %p2025_p7 = por %p2024_p0, %p2023_p13 }
  0x86   : > { %p2026_p5 = pnand %p2025_p7, %p2019_p12 }
  0x88   : > { %2029 = shalt.err (!%p2026_p5)
}
  0x89   : > { %s2030_s20 = scalar_lea.vmem %s2532_s13, 64  ;;  %s2271_s8 = smov [#allocation6]  }
  0x8a   : > { %p2031_p8 = scmp.ne.s32.totalorder %s2532_s13, %s2030_s20  ;;  %s2035_s30 = sshll.u32 %s2271_s8, 4  ;;  %s2036_s30 = int_to_ptr.vmem [resolvable:$false] %s2035_s30 }
  0x8b   : > { %s2037_s7 = scalar_lea.vmem %s2036_s30, 128  ;;  %p2038_p4 = scmp.lt.s32.totalorder %s2532_s13, %s2036_s30 }
  0x8c   : > { %p2033_p3 = pnand %p2031_p8, %p2017_p1  ;;  %p2039_p11 = scmp.lt.s32.totalorder %s2037_s7, %s2030_s20 }
  0x8e   : > { %p2034_p9 = pneg %p2033_p3  ;;  %p2040_p6 = por %p2039_p11, %p2038_p4 }
  0x90   : > { %p2041_p13 = pnand %p2040_p6, %p2034_p9 }
  0x92   : > { %2044 = shalt.err (!%p2041_p13)
}
  0x93   : > { %1652 = dma.hbm_to_vmem [thread:$0]  (!%p2528_p10), %s2524_s27, 64, %s2532_s13, %s269_s11  }
  0x94   : > { %p2841_p12 = scmp.ne.s32.totalorder %s2830_s29, 0 }
  0x95   : > { %s2562_s1 = sand.u32 (!%p2841_p12), 1, %s2183_s22  }
  0x96   : > { %288 = sbr.rel (%p2841_p12) target bundleno = 3756 (0xeac), region = 44  ;;  %s1450_s15 = sshll.u32 (!%p2841_p12), %s2562_s1, 2 }
  0x97   : > { %s291_s12 = scalar_lea.sflag (!%p2841_p12), [#allocation7], %s2562_s1  ;;  %s2566_s10 = scalar_lea.vmem (!%p2841_p12), [#allocation6], %s1450_s15 }
  0x9d   : > { %2162 = dma.done.wait (%p2503_p2), %s291_s12, 64  }
  0x9e   : > { %2164 = vsyncadd (%p2503_p2), %s291_s12, 4294967232  ;;  %p2842_p4 = scmp.ne.s32.totalorder %s2829_s28, 0 }
  0xa0   : > { %2166 = dma.done.wait (%p2842_p4), [#allocation10], 512  }
  0xa1   : > { %2168 = vsyncadd (%p2842_p4), [#allocation10], 4294966784 }
  0xa2   : > { %2170 = dma.done.wait (%p2842_p4), [#allocation13], 512  }
  0xa3   : > { %2172 = vsyncadd (%p2842_p4), [#allocation13], 4294966784  ;;  %s1455_s29 = sshll.u32 %s2562_s1, 3  ;;  %v2272_v0 = vmov 0.0   ;;  %vm2273_vm0 = vmmov 0   ;;  %v1865_v1 = vld [vmem:[#allocation11] sm:$0xff]   ;;  %v535_v9 = vlaneseq }
  0xa4   : > { %1536 = vmatprep.subr.bf16.mxu0 %v2272_v0  ;;  %1540 = vmatprep.mubr.msk.bf16.mxu0 %vm2273_vm0, %v2272_v0  ;;  %v1866_v2 = vld [vmem:[#allocation11 + $0x8] sm:$0xff]   ;;  %v1869_v3 = vld [vmem:[#allocation12] sm:$0xff]   ;;  %vm361_vm1 = vcmask 261120   ;;  %v1870_v6 = vld [vmem:[#allocation12 + $0x8] sm:$0xff]   ;;  %vm406_vm2 = vcmask 257024   ;;  %s2609_s28 = scalar_lea.vmem [#allocation15], %s1455_s29 }
  0xa5   : > { %1544 = vmatprep.subr.bf16.mxu1 %v2272_v0  ;;  %1548 = vmatprep.mubr.msk.bf16.mxu1 %vm2273_vm0, %v2272_v0  ;;  %v344_v4 = vld [vmem:[%s2566_s10] sm:$0xf]  ;;  %v1867_v5 = vld [vmem:[#allocation9] sm:$0xff]   ;;  %v1868_v7 = vld [vmem:[#allocation9 + $0x8] sm:$0xff]   ;;  %v2598_v10 = vshrl.u32 %v535_v9, 7  ;;  %v2600_v11 = vand.u32 127, %v535_v9 }
  0xa6   : > { %1537 = vmatpush3.bf16.msra.mxu0 %v1865_v1  ;;  %1545 = vmatpush3.bf16.msra.mxu1 %v1869_v3  ;;  %v471_v8 = vld [vmem:[%s2566_s10] sm:$0xf]  ;;  %v2611_v28 = vmov 0.0   ;;  %v2613_v29 = vmov 0.0   ;;  %v2615_v30 = vmov -1e+30  }
  0xa7   : > { %1538 = vmatprep.subr.bf16.mxu0 %v2272_v0  ;;  %1546 = vmatprep.subr.bf16.mxu1 %v2272_v0  ;;  %s2617_s14 = smov 0  }
  0xaa   : > { %1539 = vmatpush3.bf16.msra.mxu0 %v1866_v2  ;;  %1547 = vmatpush3.bf16.msra.mxu1 %v1870_v6 }
  0xab   : > { %1552 = vmatprep.subr.bf16.mxu0 %v2272_v0 }
  0xad   : > { %1541 = vmatmul.mubr.msk.bf16.vlgmr.msra.gmra.mrb[0].mxu0 %vm361_vm1, %v344_v4  ;;  %1549 = vmatmul.mubr.msk.bf16.vlgmr.msra.gmra.mrb[0].mxu1 %vm361_vm1, %v344_v4 }
  0xae   : > { %1553 = vmatpush3.bf16.msra.mxu0 %v1867_v5  ;;  %1556 = vmatprep.mubr.msk.bf16.mxu0 %vm2273_vm0, %v2272_v0 }
  0xaf   : > { %1554 = vmatprep.subr.bf16.mxu0 %v2272_v0 }
  0xb2   : > { %1555 = vmatpush3.bf16.msra.mxu0 %v1868_v7 }
  0xb5   : > { %1557 = vmatmul.mubr.msk.bf16.vlgmr.msra.gmra.mrb[4].mxu0 %vm361_vm1, %v471_v8 }
 0x180   : > { %v399_v12 = vpop.f32.mrb[0].mxu0  ;;  %v458_v17 = vpop.f32.mrb[0].mxu1 }
 0x181   : > { %v405_v13 = vpack.c.bf16 %v399_v12, %v399_v12  ;;  %v1542_v14 = vpop.f32.mrb[1].mxu0  ;;  %v464_v18 = vpack.c.bf16 %v458_v17, %v458_v17  ;;  %v1550_v19 = vpop.f32.mrb[1].mxu1 }
 0x182   : > { %v402_v15 = vpop.f32.mrb[2].mxu0  ;;  %v461_v20 = vpop.f32.mrb[2].mxu1 }
 0x183   : > { %407 = vst.msk [vmem:[#allocation3] sm:$0xf] %vm406_vm2, %v405_v13  ;;  %v1543_v16 = vpop.f32.mrb[3].mxu0  ;;  %465 = vst.msk [vmem:[#allocation4] sm:$0xf] %vm406_vm2, %v464_v18  ;;  %v1551_v22 = vpop.f32.mrb[3].mxu1 }
 0x188   : > { %v526_v21 = vpop.f32.mrb[4].mxu0 }
 0x189   : > { %v532_v23 = vpack.c.bf16 %v526_v21, %v526_v21  ;;  %v1558_v24 = vpop.f32.mrb[5].mxu0 }
 0x18a   : > { %v529_v25 = vpop.f32.mrb[6].mxu0 }
 0x18b   : > { %534 = vst.msk [vmem:[#allocation2] sm:$0xf] %vm406_vm2, %v532_v23  ;;  %v1559_v26 = vpop.f32.mrb[7].mxu0 }
 0x192   : > { %v2605_v27 = vld [vmem:[#allocation2] sm:$0xf] }
 0x193 LB: >> { %v2274_v31 = vmov 0.0   ;;  %vm2275_vm3 = vmmov 0   ;;  %s1465_s27 = sshll.u32 %s2215_s14, 3  ;;  %vm561_vm4 = vcmask 64512   ;;  %vm632_vm6 = vcmask 1043456   ;;  %s546_s14 = sadd.s32 1, %s2215_s14   ;;  %s2215_s14 = sphi %s2617_s14, %s546_s14   ;;  %v2211_v30 = vphi %v2615_v30, %v2845_v30   ;;  %v2207_v29 = vphi %v2613_v29, %v2844_v29   ;;  %v2203_v28 = vphi %v2611_v28, %v2843_v28  }
 0x194   : >> { %1560 = vmatprep.subr.bf16.mxu0 %v2274_v31  ;;  %1562 = vmatprep.mubr.msk.bf16.mxu0 %vm2275_vm3, %v2274_v31  ;;  %s553_s13 = sshra.s32 %s1465_s27, 3  ;;  %v608_v34 = vstv %s1465_s27  ;;  %p545_p2 = scmp.ge.s32.totalorder %s546_s14, 1 }
 0x195   : >> { %1566 = vmatprep.subr.bf16.mxu1 %v2274_v31  ;;  %1568 = vmatprep.mubr.msk.bf16.mxu1 %vm2275_vm3, %v2274_v31  ;;  %s1466_s9 = sshll.u32 %s553_s13, 2  ;;  %v609_v35 = vadd.s32 %v608_v34, %v2600_v11  ;;  %v2644_v63 = vld [vmem:[#allocation2] sm:$0xf] (%p545_p2)  ;;  %vm680_vm7 = vcmask (%p545_p2), 60416   ;;  %v2646_v4 = vmov (%p545_p2), 0.0   ;;  %v2648_v5 = vmov (%p545_p2), 0.0  }
 0x196   : >> { %s556_s11 = scalar_lea.vmem [#allocation3], %s1466_s9  ;;  %s559_s20 = scalar_lea.vmem [#allocation4], %s1466_s9  ;;  %v2650_v6 = vmov (%p545_p2), -1e+30  }
 0x197   : >> { %v557_v32 = vld [vmem:[%s556_s11] sm:$0xf]  ;;  %vm610_vm5 = vcmp.ge.s32.totalorder %v2598_v10, %v609_v35  ;;  %s2652_s8 = smov (%p545_p2), 0  }
 0x198   : >> { %v566_v33 = vsel %vm561_vm4, %v557_v32, 0  ;;  %v560_v42 = vld [vmem:[%s559_s20] sm:$0xf] }
 0x199   : >> { %1561 = vmatpush3.bf16.xpose.msra.mxu0 %v566_v33  ;;  %v634_v43 = vsel %vm632_vm6, %v560_v42, 0 }
 0x19a   : >> { %1567 = vmatpush3.bf16.msra.mxu1 %v634_v43 }
 0x1a0   : >> { %1563 = vmatmul.mubr.msk.bf16.vlgmr.msra.gmra.mrb[0].mxu0 %vm561_vm4, %v2605_v27 }
 0x273   : >> { %v602_v36 = vpop.f32.mrb[0].mxu0 }
 0x274   : >> { %v611_v37 = vsel %vm610_vm5, %v602_v36, -1e+30  ;;  %v1564_v38 = vpop.f32.mrb[1].mxu0 }
 0x275   : >> { %v605_v39 = vpop.f32.mrb[2].mxu0  ;;  %v612_v40 = vsel %vm561_vm4, %v611_v37, -inf }
 0x276   : >> { %613 = vmax.xlane.f32.xlu0 %v612_v40  ;;  %v1565_v41 = vpop.f32.mrb[3].mxu0 }
 0x303   : >> { %v614_v44 = vpop.xlane.xlu0 %613 }
 0x304   : >> { %v615_v45 = vmax.f32 %v2211_v30, %v614_v44  }
 0x306   : >> { %v616_v46 = vsub.f32 %v2211_v30, %v615_v45  ;;  %v619_v47 = vsub.f32 %v611_v37, %v615_v45  ;;  %v2845_v30 = vmov %v615_v45 }
 0x308   : >> { %v620_v48 = vmul.f32 1.442695, %v619_v47  ;;  %v617_v52 = vmul.f32 1.442695, %v616_v46 }
 0x30a   : >> { %1871 = vpow2.f32 %v620_v48 }
 0x30b   : >> { %1873 = vpow2.f32 %v617_v52 }
 0x314   : >> { %v1872_v49 = vpop.eup %1871 }
 0x315   : >> { %v622_v50 = vsel %vm561_vm4, %v1872_v49, 0.0  ;;  %v625_v51 = vpack.c.bf16 %v1872_v49, %v1872_v49  ;;  %v1874_v53 = vpop.eup %1873 }
 0x316   : >> { %623 = vadd.xlane.f32.xlu0 %v622_v50  ;;  %v626_v54 = vmul.f32 %v2207_v29, %v1874_v53  ;;  %v628_v57 = vmul.f32 %v2203_v28, %v1874_v53 }
 0x317   : >> { %1569 = vmatmul.mubr.msk.bf16.vlgmr.msra.gmra.mrb[0].mxu1 %vm561_vm4, %v625_v51 }
 0x3a3   : >> { %v624_v55 = vpop.xlane.xlu0 %623 }
 0x3a4   : >> { %v627_v56 = vadd.f32 %v626_v54, %v624_v55  }
 0x3a6   : >> { %v2844_v29 = vmov %v627_v56  ;;  %1875 = vrcp.f32 (%p545_p2), %v627_v56 }
 0x3b0   : > { %v1876_v1 = vpop.eup (%p545_p2), %1875 }
 0x3e7   : > { %548 = sbr.rel (!%p545_p2) target bundleno = 403 (0x193), region = 146 }
 0x3ea   : >> { %v670_v58 = vpop.f32.mrb[0].mxu1 }
 0x3eb   : >> { %v676_v59 = vadd.f32 %v670_v58, %v628_v57   ;;  %v1570_v60 = vpop.f32.mrb[1].mxu1 }
 0x3ec   : >> { %v673_v61 = vpop.f32.mrb[2].mxu1 }
 0x3ed   : >> { %v1571_v62 = vpop.f32.mrb[3].mxu1  ;;  %v2843_v28 = vmov %v676_v59  ;;  %v678_v2 = vmul.f32 (%p545_p2), %v1876_v1, %v676_v59 }
 0x3ef   : > { %v679_v3 = vpack.c.bf16 %v678_v2, %v678_v2 }
 0x3f1   : > { %681 = vst.msk [vmem:[#allocation5] sm:$0xf] %vm680_vm7, %v679_v3 }
 0x3f2 LB: >> { %v2276_v7 = vmov 0.0   ;;  %vm2277_vm8 = vmmov 0   ;;  %s1470_s30 = sshll.u32 %s2231_s8, 3  ;;  %s2278_s29 = smov 120   ;;  %v1473_v9 = vcombine.low %v2644_v63, %v2644_v63  ;;  %s2231_s8 = sphi %s2652_s8, %s686_s8   ;;  %v2227_v6 = vphi %v2650_v6, %v2848_v6   ;;  %v2223_v5 = vphi %v2648_v5, %v2847_v5   ;;  %v2219_v4 = vphi %v2646_v4, %v2846_v4  }
 0x3f3   : >> { %1572 = vmatprep.subr.bf16.mxu0 %v2276_v7  ;;  %1574 = vmatprep.mubr.msk.bf16.mxu0 %vm2277_vm8, %v2276_v7  ;;  %s693_s7 = sshra.s32 %s1470_s30, 3  ;;  %v758_v15 = vstv %s1470_s30  ;;  %s686_s8 = sadd.s32 1, %s2231_s8  }
 0x3f4   : >> { %1578 = vmatprep.subr.bf16.mxu1 %v2276_v7  ;;  %1580 = vmatprep.mubr.msk.bf16.mxu1 %vm2277_vm8, %v2276_v7  ;;  %s1471_s15 = sshll.u32 %s693_s7, 2  ;;  %v759_v16 = vadd.s32 %v758_v15, %v2600_v11  ;;  %p685_p9 = scmp.ge.s32.totalorder %s686_s8, 1 }
 0x3f5   : >> { %s696_s12 = scalar_lea.vmem [#allocation3], %s1471_s15  ;;  %s699_s10 = scalar_lea.vmem [#allocation4], %s1471_s15  ;;  %v2680_v45 = vld [vmem:[#allocation2] sm:$0xf] (%p685_p9)  ;;  %vm841_vm10 = vcmask (%p685_p9), 126016   ;;  %v2682_v50 = vmov (%p685_p9), 0.0  }
 0x3f6   : >> { %v1877_v8 = vld [vmem:[%s696_s12] ss:$0 sps:$4 sm:$0xff]   ;;  %vm760_vm9 = vcmp.ge.s32.totalorder %v2598_v10, %v759_v16  ;;  %s2279_s14 = smov (%p685_p9), 8   ;;  %v2684_v51 = vmov (%p685_p9), 0.0   ;;  %v2686_v52 = vmov (%p685_p9), -1e+30  }
 0x3f7   : >> { %709 = vrot.lane.b32.xlu0 %v1877_v8, %s2278_s29  ;;  %v1878_v23 = vld [vmem:[%s699_s10] ss:$0 sps:$4 sm:$0xff]   ;;  %s2688_s27 = smov (%p685_p9), 0  }
 0x3fb   : >> { %704 = vrot.lane.b32.xlu0 %v1473_v9, %s2278_s29 }
 0x469   : >> { %v710_v12 = vpop.permute.xlu0 %709 }
 0x46a   : >> { %v716_v13 = vsel %vm561_vm4, %v710_v12, 0 }
 0x46b   : >> { %1573 = vmatpush3.bf16.xpose.msra.mxu0 %v716_v13 }
 0x46d   : >> { %v705_v14 = vpop.permute.xlu0 %704 }
 0x472   : >> { %1575 = vmatmul.mubr.msk.bf16.vlgmr.msra.gmra.mrb[0].mxu0 %vm561_vm4, %v705_v14 }
 0x545   : >> { %v752_v17 = vpop.f32.mrb[0].mxu0 }
 0x546   : >> { %v761_v18 = vsel %vm760_vm9, %v752_v17, -1e+30  ;;  %v1576_v19 = vpop.f32.mrb[1].mxu0 }
 0x547   : >> { %v755_v20 = vpop.f32.mrb[2].mxu0  ;;  %v762_v21 = vsel %vm561_vm4, %v761_v18, -inf }
 0x548   : >> { %763 = vmax.xlane.f32.xlu1 %v762_v21  ;;  %v1577_v22 = vpop.f32.mrb[3].mxu0 }
 0x559   : >> { %782 = vrot.lane.b32.xlu1 %v1878_v23, %s2278_s29 }
 0x5d5   : >> { %v764_v24 = vpop.xlane.xlu1 %763 }
 0x5d6   : >> { %v765_v25 = vmax.f32 %v2227_v6, %v764_v24  }
 0x5d8   : >> { %v766_v26 = vsub.f32 %v2227_v6, %v765_v25  ;;  %v769_v27 = vsub.f32 %v761_v18, %v765_v25  ;;  %v2848_v6 = vmov %v765_v25 }
 0x5d9   : >> { %v783_v28 = vpop.permute.xlu1 %782 }
 0x5da   : >> { %v770_v29 = vmul.f32 1.442695, %v769_v27  ;;  %v789_v30 = vsel %vm632_vm6, %v783_v28, 0  ;;  %v767_v34 = vmul.f32 1.442695, %v766_v26 }
 0x5db   : >> { %1579 = vmatpush3.bf16.msra.mxu1 %v789_v30 }
 0x5dc   : >> { %1879 = vpow2.f32 %v770_v29 }
 0x5dd   : >> { %1881 = vpow2.f32 %v767_v34 }
 0x5e6   : >> { %v1880_v31 = vpop.eup %1879 }
 0x5e7   : >> { %v772_v32 = vsel %vm561_vm4, %v1880_v31, 0.0  ;;  %v775_v33 = vpack.c.bf16 %v1880_v31, %v1880_v31  ;;  %v1882_v35 = vpop.eup %1881 }
 0x5e8   : >> { %773 = vadd.xlane.f32.xlu0 %v772_v32  ;;  %v776_v36 = vmul.f32 %v2223_v5, %v1882_v35  ;;  %v778_v39 = vmul.f32 %v2219_v4, %v1882_v35 }
 0x5e9   : >> { %1581 = vmatmul.mubr.msk.bf16.vlgmr.msra.gmra.mrb[0].mxu1 %vm561_vm4, %v775_v33 }
 0x675   : >> { %v774_v37 = vpop.xlane.xlu0 %773 }
 0x676   : >> { %v777_v38 = vadd.f32 %v776_v36, %v774_v37  }
 0x678   : >> { %v2847_v5 = vmov %v777_v38  ;;  %1883 = vrcp.f32 (%p685_p9), %v777_v38 }
 0x682   : > { %v1884_v46 = vpop.eup (%p685_p9), %1883 }
 0x6b9   : > { %688 = sbr.rel (!%p685_p9) target bundleno = 1010 (0x3f2), region = 157 }
 0x6bc   : >> { %v825_v40 = vpop.f32.mrb[0].mxu1 }
 0x6bd   : >> { %v831_v41 = vadd.f32 %v825_v40, %v778_v39   ;;  %v1582_v42 = vpop.f32.mrb[1].mxu1 }
 0x6be   : >> { %v828_v43 = vpop.f32.mrb[2].mxu1 }
 0x6bf   : >> { %v1583_v44 = vpop.f32.mrb[3].mxu1  ;;  %v2846_v4 = vmov %v831_v41  ;;  %v833_v47 = vmul.f32 (%p685_p9), %v1884_v46, %v831_v41 }
 0x6c1   : > { %v1505_v48 = vpack.c.bf16 %v833_v47, %v833_v47 }
 0x6c3   : > { %838 = vrot.lane.b32.xlu0 %v1505_v48, %s2279_s14 }
 0x735   : > { %v839_v49 = vpop.permute.xlu0 %838 }
 0x736   : > { %842 = vst.msk [vmem:[#allocation5] sm:$0xf] %vm841_vm10, %v839_v49 }
 0x737 LB: >> { %v2280_v53 = vmov 0.0   ;;  %vm2281_vm11 = vmmov 0   ;;  %s1479_s13 = sshll.u32 %s2247_s27, 3  ;;  %s2282_s30 = smov 112   ;;  %v1482_v55 = vcombine.low %v2680_v45, %v2680_v45  ;;  %s2247_s27 = sphi %s2688_s27, %s847_s27   ;;  %v2243_v52 = vphi %v2686_v52, %v2851_v52   ;;  %v2239_v51 = vphi %v2684_v51, %v2850_v51   ;;  %v2235_v50 = vphi %v2682_v50, %v2849_v50  }
 0x738   : >> { %1584 = vmatprep.subr.bf16.mxu0 %v2280_v53  ;;  %1586 = vmatprep.mubr.msk.bf16.mxu0 %vm2281_vm11, %v2280_v53  ;;  %s854_s9 = sshra.s32 %s1479_s13, 3  ;;  %v919_v59 = vstv %s1479_s13  ;;  %s847_s27 = sadd.s32 1, %s2247_s27  }
 0x739   : >> { %1590 = vmatprep.subr.bf16.mxu1 %v2280_v53  ;;  %1592 = vmatprep.mubr.msk.bf16.mxu1 %vm2281_vm11, %v2280_v53  ;;  %s1480_s11 = sshll.u32 %s854_s9, 2  ;;  %v920_v60 = vadd.s32 %v919_v59, %v2600_v11  ;;  %p846_p10 = scmp.ge.s32.totalorder %s847_s27, 1 }
 0x73a   : >> { %s857_s20 = scalar_lea.vmem [#allocation3], %s1480_s11  ;;  %s860_s8 = scalar_lea.vmem [#allocation4], %s1480_s11  ;;  %v2716_v28 = vld [vmem:[#allocation2] sm:$0xf] (%p846_p10)  ;;  %vm1002_vm13 = vcmask (%p846_p10), 191616   ;;  %v2718_v33 = vmov (%p846_p10), 0.0  }
 0x73b   : >> { %v1885_v54 = vld [vmem:[%s857_s20] ss:$0 sps:$4 sm:$0xff]   ;;  %vm921_vm12 = vcmp.ge.s32.totalorder %v2598_v10, %v920_v60  ;;  %s2283_s7 = smov (%p846_p10), 16   ;;  %v2720_v34 = vmov (%p846_p10), 0.0   ;;  %v2722_v35 = vmov (%p846_p10), -1e+30  }
 0x73c   : >> { %870 = vrot.lane.b32.xlu0 %v1885_v54, %s2282_s30  ;;  %v1886_v4 = vld [vmem:[%s860_s8] ss:$0 sps:$4 sm:$0xff]   ;;  %s2724_s15 = smov (%p846_p10), 0  }
 0x740   : >> { %865 = vrot.lane.b32.xlu0 %v1482_v55, %s2282_s30 }
 0x7ae   : >> { %v871_v56 = vpop.permute.xlu0 %870 }
 0x7af   : >> { %v877_v57 = vsel %vm561_vm4, %v871_v56, 0 }
 0x7b0   : >> { %1585 = vmatpush3.bf16.xpose.msra.mxu0 %v877_v57 }
 0x7b2   : >> { %v866_v58 = vpop.permute.xlu0 %865 }
 0x7b7   : >> { %1587 = vmatmul.mubr.msk.bf16.vlgmr.msra.gmra.mrb[0].mxu0 %vm561_vm4, %v866_v58 }
 0x88a   : >> { %v913_v61 = vpop.f32.mrb[0].mxu0 }
 0x88b   : >> { %v922_v62 = vsel %vm921_vm12, %v913_v61, -1e+30  ;;  %v1588_v63 = vpop.f32.mrb[1].mxu0 }
 0x88c   : >> { %v916_v1 = vpop.f32.mrb[2].mxu0  ;;  %v923_v2 = vsel %vm561_vm4, %v922_v62, -inf }
 0x88d   : >> { %924 = vmax.xlane.f32.xlu1 %v923_v2  ;;  %v1589_v3 = vpop.f32.mrb[3].mxu0 }
 0x89e   : >> { %943 = vrot.lane.b32.xlu1 %v1886_v4, %s2282_s30 }
 0x91a   : >> { %v925_v5 = vpop.xlane.xlu1 %924 }
 0x91b   : >> { %v926_v6 = vmax.f32 %v2243_v52, %v925_v5  }
 0x91d   : >> { %v927_v7 = vsub.f32 %v2243_v52, %v926_v6  ;;  %v930_v8 = vsub.f32 %v922_v62, %v926_v6  ;;  %v2851_v52 = vmov %v926_v6 }
 0x91e   : >> { %v944_v9 = vpop.permute.xlu1 %943 }
 0x91f   : >> { %v931_v12 = vmul.f32 1.442695, %v930_v8  ;;  %v950_v13 = vsel %vm632_vm6, %v944_v9, 0  ;;  %v928_v17 = vmul.f32 1.442695, %v927_v7 }
 0x920   : >> { %1591 = vmatpush3.bf16.msra.mxu1 %v950_v13 }
 0x921   : >> { %1887 = vpow2.f32 %v931_v12 }
 0x922   : >> { %1889 = vpow2.f32 %v928_v17 }
 0x92b   : >> { %v1888_v14 = vpop.eup %1887 }
 0x92c   : >> { %v933_v15 = vsel %vm561_vm4, %v1888_v14, 0.0  ;;  %v936_v16 = vpack.c.bf16 %v1888_v14, %v1888_v14  ;;  %v1890_v18 = vpop.eup %1889 }
 0x92d   : >> { %934 = vadd.xlane.f32.xlu0 %v933_v15  ;;  %v937_v19 = vmul.f32 %v2239_v51, %v1890_v18  ;;  %v939_v22 = vmul.f32 %v2235_v50, %v1890_v18 }
 0x92e   : >> { %1593 = vmatmul.mubr.msk.bf16.vlgmr.msra.gmra.mrb[0].mxu1 %vm561_vm4, %v936_v16 }
 0x9ba   : >> { %v935_v20 = vpop.xlane.xlu0 %934 }
 0x9bb   : >> { %v938_v21 = vadd.f32 %v937_v19, %v935_v20  }
 0x9bd   : >> { %v2850_v51 = vmov %v938_v21  ;;  %1891 = vrcp.f32 (%p846_p10), %v938_v21 }
 0x9c7   : > { %v1892_v29 = vpop.eup (%p846_p10), %1891 }
 0x9fe   : > { %849 = sbr.rel (!%p846_p10) target bundleno = 1847 (0x737), region = 168 }
 0xa01   : >> { %v986_v23 = vpop.f32.mrb[0].mxu1 }
 0xa02   : >> { %v992_v24 = vadd.f32 %v986_v23, %v939_v22   ;;  %v1594_v25 = vpop.f32.mrb[1].mxu1 }
 0xa03   : >> { %v989_v26 = vpop.f32.mrb[2].mxu1 }
 0xa04   : >> { %v1595_v27 = vpop.f32.mrb[3].mxu1  ;;  %v2849_v50 = vmov %v992_v24  ;;  %v994_v30 = vmul.f32 (%p846_p10), %v1892_v29, %v992_v24 }
 0xa06   : > { %v1506_v31 = vpack.c.bf16 %v994_v30, %v994_v30 }
 0xa08   : > { %999 = vrot.lane.b32.xlu0 %v1506_v31, %s2283_s7 }
 0xa7a   : > { %v1000_v32 = vpop.permute.xlu0 %999 }
 0xa7b   : > { %1003 = vst.msk [vmem:[#allocation5] sm:$0xf] %vm1002_vm13, %v1000_v32 }
 0xa7c LB: >> { %v2284_v36 = vmov 0.0   ;;  %vm2285_vm14 = vmmov 0   ;;  %s1488_s12 = sshll.u32 %s2263_s15, 3  ;;  %s2286_s13 = smov 104   ;;  %v1491_v38 = vcombine.low %v2716_v28, %v2716_v28  ;;  %s2263_s15 = sphi %s2724_s15, %s1008_s15   ;;  %v2259_v35 = vphi %v2722_v35, %v2854_v35   ;;  %v2255_v34 = vphi %v2720_v34, %v2853_v34   ;;  %v2251_v33 = vphi %v2718_v33, %v2852_v33  }
 0xa7d   : >> { %1596 = vmatprep.subr.bf16.mxu0 %v2284_v36  ;;  %1598 = vmatprep.mubr.msk.bf16.mxu0 %vm2285_vm14, %v2284_v36  ;;  %s1015_s10 = sshra.s32 %s1488_s12, 3  ;;  %v1080_v42 = vstv %s1488_s12  ;;  %s1008_s15 = sadd.s32 1, %s2263_s15  }
 0xa7e   : >> { %1602 = vmatprep.subr.bf16.mxu1 %v2284_v36  ;;  %1604 = vmatprep.mubr.msk.bf16.mxu1 %vm2285_vm14, %v2284_v36  ;;  %s1489_s29 = sshll.u32 %s1015_s10, 2  ;;  %v1081_v43 = vadd.s32 %v1080_v42, %v2600_v11  ;;  %p1007_p1 = scmp.ge.s32.totalorder %s1008_s15, 1 }
 0xa7f   : >> { %s1018_s14 = scalar_lea.vmem [#allocation3], %s1489_s29  ;;  %s1021_s27 = scalar_lea.vmem [#allocation4], %s1489_s29  ;;  %v1899_v9 = vld [vmem:[#allocation14] sm:$0xff] (%p1007_p1)   ;;  %v1900_v12 = vld [vmem:[#allocation14 + $0x8] sm:$0xff] (%p1007_p1)   ;;  %vm1163_vm2 = vcmask (%p1007_p1), 257216  }
 0xa80   : >> { %v1893_v37 = vld [vmem:[%s1018_s14] ss:$0 sps:$4 sm:$0xff]   ;;  %vm1082_vm15 = vcmp.ge.s32.totalorder %v2598_v10, %v1081_v43  ;;  %s2287_s9 = smov (%p1007_p1), 24   ;;  %s1502_s8 = sshll.u32 (%p1007_p1), %s2191_s24, 7 }
 0xa81   : >> { %1031 = vrot.lane.b32.xlu0 %v1893_v37, %s2286_s13  ;;  %v1894_v50 = vld [vmem:[%s1021_s27] ss:$0 sps:$4 sm:$0xff]   ;;  %s1248_s30 = sshll.u32 (%p1007_p1), %s2609_s28, 4  ;;  %s2765_s12 = scalar_lea.hbm (%p1007_p1), %s2822_s6, %s1502_s8  ;;  %s2767_s30 = int_to_ptr.vmem [resolvable:$true] %s1248_s30 }
 0xa82   : > { %v1497_v16 = vld [vmem:[%s2821_s5] ss:$0 sm:$0xff] (%p1007_p1)  ;;  %s1234_s10 = scalar_lea.sflag (%p1007_p1), [#allocation8], %s2562_s1  ;;  %s2045_s24 = scalar_lea.vmem (%p1007_p1), %s2767_s30, 128 }
 0xa83   : > { %p2046_p0 = scmp.ne.s32.totalorder (%p1007_p1), %s2767_s30, %s2045_s24  ;;  %p2855_p7 = scmp.ne.s32.totalorder (%p1007_p1), %s2838_s16, 0 }
 0xa84   : > { %s2288_s29 = smov (%p1007_p1), [#allocation15]  }
 0xa85   : >> { %1026 = vrot.lane.b32.xlu0 %v1491_v38, %s2286_s13  ;;  %p2047_p5 = pnand (%p1007_p1), %p2046_p0, %p2855_p7  ;;  %s2049_s14 = sshll.u32 (%p1007_p1), %s2288_s29, 4  ;;  %s2050_s14 = int_to_ptr.vmem [resolvable:$false] %s2049_s14 }
 0xa86   : > { %s2051_s27 = scalar_lea.vmem (%p1007_p1), %s2050_s14, 256  ;;  %p2052_p3 = scmp.lt.s32.totalorder (%p1007_p1), %s2767_s30, %s2050_s14 }
 0xa87   : > { %p2048_p8 = pneg (%p1007_p1), %p2047_p5  ;;  %p2053_p11 = scmp.lt.s32.totalorder (%p1007_p1), %s2051_s27, %s2045_s24 }
 0xa89   : > { %p2054_p6 = por (%p1007_p1), %p2053_p11, %p2052_p3 }
 0xa8b   : > { %p2055_p13 = pnand (%p1007_p1), %p2054_p6, %p2048_p8 }
 0xaf3   : >> { %v1032_v39 = vpop.permute.xlu0 %1031 }
 0xaf4   : >> { %v1038_v40 = vsel %vm561_vm4, %v1032_v39, 0 }
 0xaf5   : >> { %1597 = vmatpush3.bf16.xpose.msra.mxu0 %v1038_v40 }
 0xaf6   : > { %1608 = vmatprep.subr.bf16.mxu0 (%p1007_p1), %v2272_v0 }
 0xaf7   : >> { %v1027_v41 = vpop.permute.xlu0 %1026 }
 0xafc   : >> { %1599 = vmatmul.mubr.msk.bf16.vlgmr.msra.gmra.mrb[0].mxu0 %vm561_vm4, %v1027_v41 }
 0xafd   : > { %1612 = vmatprep.mubr.msk.bf16.mxu0 (%p1007_p1), %vm2273_vm0, %v2272_v0  ;;  %1609 = vmatpush3.bf16.msra.mxu0 (%p1007_p1), %v1899_v9 }
 0xafe   : > { %1610 = vmatprep.subr.bf16.mxu0 (%p1007_p1), %v2272_v0 }
 0xb01   : > { %1611 = vmatpush3.bf16.msra.mxu0 (%p1007_p1), %v1900_v12 }
 0xbcf   : >> { %v1074_v44 = vpop.f32.mrb[0].mxu0 }
 0xbd0   : >> { %v1083_v45 = vsel %vm1082_vm15, %v1074_v44, -1e+30  ;;  %v1600_v46 = vpop.f32.mrb[1].mxu0 }
 0xbd1   : >> { %v1077_v47 = vpop.f32.mrb[2].mxu0  ;;  %v1084_v48 = vsel %vm561_vm4, %v1083_v45, -inf }
 0xbd2   : >> { %1085 = vmax.xlane.f32.xlu1 %v1084_v48  ;;  %v1601_v49 = vpop.f32.mrb[3].mxu0 }
 0xbe3   : >> { %1104 = vrot.lane.b32.xlu1 %v1894_v50, %s2286_s13 }
 0xc5f   : >> { %v1086_v51 = vpop.xlane.xlu1 %1085 }
 0xc60   : >> { %v1087_v52 = vmax.f32 %v2259_v35, %v1086_v51  }
 0xc62   : >> { %v1088_v53 = vsub.f32 %v2259_v35, %v1087_v52  ;;  %v1091_v54 = vsub.f32 %v1083_v45, %v1087_v52  ;;  %v2854_v35 = vmov %v1087_v52 }
 0xc63   : >> { %v1105_v55 = vpop.permute.xlu1 %1104 }
 0xc64   : >> { %v1092_v56 = vmul.f32 1.442695, %v1091_v54  ;;  %v1111_v57 = vsel %vm632_vm6, %v1105_v55, 0  ;;  %v1089_v61 = vmul.f32 1.442695, %v1088_v53 }
 0xc65   : >> { %1603 = vmatpush3.bf16.msra.mxu1 %v1111_v57 }
 0xc66   : >> { %1895 = vpow2.f32 %v1092_v56 }
 0xc67   : >> { %1897 = vpow2.f32 %v1089_v61 }
 0xc70   : >> { %v1896_v58 = vpop.eup %1895 }
 0xc71   : >> { %v1094_v59 = vsel %vm561_vm4, %v1896_v58, 0.0  ;;  %v1097_v60 = vpack.c.bf16 %v1896_v58, %v1896_v58  ;;  %v1898_v62 = vpop.eup %1897 }
 0xc72   : >> { %1095 = vadd.xlane.f32.xlu0 %v1094_v59  ;;  %v1098_v63 = vmul.f32 %v2255_v34, %v1898_v62  ;;  %v1100_v3 = vmul.f32 %v2251_v33, %v1898_v62 }
 0xc73   : >> { %1605 = vmatmul.mubr.msk.bf16.vlgmr.msra.gmra.mrb[0].mxu1 %vm561_vm4, %v1097_v60 }
 0xcff   : >> { %v1096_v1 = vpop.xlane.xlu0 %1095 }
 0xd00   : >> { %v1099_v2 = vadd.f32 %v1098_v63, %v1096_v1  }
 0xd02   : >> { %v2853_v34 = vmov %v1099_v2  ;;  %1901 = vrcp.f32 (%p1007_p1), %v1099_v2 }
 0xd0c   : > { %v1902_v13 = vpop.eup (%p1007_p1), %1901 }
 0xd43   : > { %1010 = sbr.rel (!%p1007_p1) target bundleno = 2684 (0xa7c), region = 179 }
 0xd46   : >> { %v1147_v4 = vpop.f32.mrb[0].mxu1 }
 0xd47   : >> { %v1153_v5 = vadd.f32 %v1147_v4, %v1100_v3   ;;  %v1606_v6 = vpop.f32.mrb[1].mxu1 }
 0xd48   : >> { %v1150_v7 = vpop.f32.mrb[2].mxu1 }
 0xd49   : >> { %v1607_v8 = vpop.f32.mrb[3].mxu1  ;;  %v2852_v33 = vmov %v1153_v5  ;;  %v1155_v14 = vmul.f32 (%p1007_p1), %v1902_v13, %v1153_v5 }
 0xd4b   : > { %v1507_v15 = vpack.c.bf16 %v1155_v14, %v1155_v14 }
 0xd4d   : > { %1160 = vrot.lane.b32.xlu0 %v1507_v15, %s2287_s9 }
 0xdbf   : > { %v1161_v10 = vpop.permute.xlu0 %1160 }
 0xdc0   : > { %1164 = vst.msk [vmem:[#allocation5] sm:$0xf] %vm1163_vm2, %v1161_v10 }
 0xdc7   : > { %v1165_v11 = vld [vmem:[#allocation5] sm:$0xf] }
 0xdc8   : > { %1613 = vmatmul.mubr.msk.bf16.vlgmr.msra.gmra.mrb[0].mxu0 %vm361_vm1, %v1165_v11 }
 0xe9b   : > { %v1226_v0 = vpop.f32.mrb[0].mxu0 }
 0xe9c   : > { %v1227_v17 = vadd.f32 %v1497_v16, %v1226_v0  ;;  %v1614_v18 = vpop.f32.mrb[1].mxu0 }
 0xe9d   : > { %v1229_v19 = vpop.f32.mrb[2].mxu0 }
 0xe9e   : > { %1232 = vst.msk [vmem:[%s2609_s28] sm:$0xff] %vm361_vm1, %v1227_v17  ;;  %v1615_v20 = vpop.f32.mrb[3].mxu0 }
 0xe9f   : > { %2058 = shalt.err (!%p2055_p13)
}
 0xea0   : > { %s2059_s1 = scalar_lea.hbm %s2765_s12, 128  ;;  %s2063_s9 = scalar_lea.hbm %s2822_s6, 256 }
 0xea1   : > { %p2060_p12 = scmp.ne.s32.totalorder %s2765_s12, %s2059_s1  ;;  %p2064_p9 = scmp.lt.u32.totalorder %s2765_s12, %s2822_s6 }
 0xea2   : > { %p2065_p10 = scmp.lt.u32.totalorder %s2063_s9, %s2059_s1  ;;  %p2067_p0 = scmp.lt.u32.totalorder %s2059_s1, %s2765_s12 }
 0xea3   : > { %p2061_p4 = pnand %p2060_p12, %p2855_p7 }
 0xea4   : > { %p2066_p1 = por %p2065_p10, %p2064_p9 }
 0xea5   : > { %p2062_p2 = pneg %p2061_p4 }
 0xea6   : > { %p2068_p5 = por %p2067_p0, %p2066_p1 }
 0xea8   : > { %p2069_p8 = pnand %p2068_p5, %p2062_p2 }
 0xeaa   : > { %2072 = shalt.err (!%p2069_p8)
}
 0xeab   : > { %1634 = dma.vmem_to_hbm [thread:$0]  (%p2855_p7), %s2767_s30, 128, %s2765_s12, %s1234_s10  }
 0xeac PF: > { %s1260_s8 = sand.u32 1, %s2179_s21   ;;  %p2856_p3 = scmp.ne.s32.totalorder %s2839_s19, 0 }
 0xead   : > { %p2857_p11 = scmp.ge.s32.totalorder %s2199_s26, 2  ;;  %s1261_s7 = scalar_lea.sflag [#allocation8], %s1260_s8 }
 0xeaf   : > { %p1654_p6 = pnand %p2857_p11, %p2856_p3 }
 0xeb1   : > { %2174 = dma.done.wait (!%p1654_p6), %s1261_s7, 128  }
 0xeb2   : > { %2176 = vsyncadd (!%p1654_p6), %s1261_s7, 4294967168  ;;  %s24_s26 = sadd.s32 1, %s2199_s26   ;;  %s2858_s21 = smov %s2183_s22 }
 0xeb3   : > { %p21_p13 = scmp.ge.s32.totalorder %s24_s26, 4   ;;  %s2859_s22 = smov %s2187_s23 }
 0xeb4   : > { %s2860_s23 = smov %s2512_s17  ;;  %s2861_s24 = smov %s2195_s25 }
 0xeb5   : > { %s2862_s25 = smov %s2864_s18  ;;  %23 = sbr.rel (!%p21_p13) target bundleno = 10 (0xa), region = 190 }
 0xebc   :  { %1266 = vsyncpa [#allocation7], 1 }
 0xebd   :  { %1268 = vsyncpa [#allocation7 + $0x1], 1 }
 0xebe   :  { %1269 = vsyncpa [#allocation10], 1 }
 0xebf   :  { %1270 = vsyncpa [#allocation13], 1 }
 0xec0   :  { %1271 = vsyncpa [#allocation8], 1 }
 0xec1   :  { %1273 = vsyncpa [#allocation8 + $0x1], 1 }

</bundles_post_ra>
